<compile_context>
chip_gen: v7x
topology: tpu7x:2x2x1
jax: 0.10.0
libtpu: 0.0.40
codegen_flags: <defaults>
</compile_context>

<pallas_src>
import math

import jax
import jax.numpy as jnp
from jax import lax
from jax.experimental import pallas as pl
from jax.experimental.pallas import tpu as pltpu


def _round_up(x: int, m: int) -> int:
    return ((x + m - 1) // m) * m


def _vmem_capacity_bytes() -> int:
    try:
        return int(pltpu.get_tpu_info().vmem_capacity_bytes)
    except Exception:
        return 64 << 20  # conservative fallback: v7x per-TensorCore VMEM


def make_mlp_kernel(eps: float):
    """eps must be a Python float so it lowers as a literal (no captured constants)."""

    def kernel(x_ref, wt_ref, bias_ref, beta_ref, gm_ref, gmg_ref, o_ref):
        # Linear: (TM, num_in) @ (num_in, num_out); bf16 operands feed the MXU
        # directly, accumulation in f32.
        y = jnp.dot(x_ref[...], wt_ref[...], preferred_element_type=jnp.float32)
        y = y + bias_ref[...]                                           # (TM, num_out) f32

        gm = gm_ref[...]    # (num_out, G) membership, pre-scaled by 1/ch_per_group
        gmg = gmg_ref[...]  # (G, num_out) membership, pre-scaled by gamma

        # Group statistics, uncentered form: the two reductions are independent MXU
        # matmuls (no mean_c / centered-difference temporaries in the chain).
        mean_g = jnp.dot(y, gm, preferred_element_type=jnp.float32)       # (TM, G)
        ex2_g = jnp.dot(y * y, gm, preferred_element_type=jnp.float32)    # (TM, G)
        var_g = ex2_g - mean_g * mean_g
        inv_std_g = lax.rsqrt(var_g + eps)                                 # (TM, G), EUP

        # Broadcast group stats back to channels with gamma folded into the matmul:
        #   a_c = gamma * inv_std,   t_c = gamma * mean * inv_std
        a_c = jnp.dot(inv_std_g, gmg, preferred_element_type=jnp.float32)            # (TM, num_out)
        t_c = jnp.dot(mean_g * inv_std_g, gmg, preferred_element_type=jnp.float32)   # (TM, num_out)

        # GN affine + ReLU tail: relu(y * a + (beta - t)) -- minimal full-plane VPU work.
        o_ref[...] = jnp.maximum(y * a_c + (beta_ref[...] - t_c), 0.0).astype(o_ref.dtype)

    return kernel


def mlp_forward(x, weight, bias, gamma, beta, num_groups, *, eps=1e-5, tm=512,
                out_dtype=None, compute_dtype=jnp.bfloat16):
    """x: (B, num_in); weight: (num_out, num_in) (PyTorch layout); bias/gamma/beta: (num_out,)."""
    B, num_in = x.shape
    num_out, k = weight.shape
    assert k == num_in
    assert num_out % num_groups == 0
    cpg = num_out // num_groups
    out_dtype = x.dtype if out_dtype is None else out_dtype

    # bf16 streaming/weight path (halves HBM bytes + native MXU dtype); GN stays f32.
    xc = x.astype(compute_dtype)
    wt = weight.T.astype(compute_dtype)            # (num_in, num_out), one-time layout fix

    # Small f32 parameter rows + group-membership matrices (VMEM-resident, constant maps).
    b_row = bias.reshape(1, num_out).astype(jnp.float32)
    beta_row = beta.reshape(1, num_out).astype(jnp.float32)
    grp = jnp.arange(num_out, dtype=jnp.int32) // cpg
    gids = jnp.arange(num_groups, dtype=jnp.int32)
    member = (grp[:, None] == gids[None, :])                               # (num_out, G) bool
    gm_scaled = member.astype(jnp.float32) * (1.0 / cpg)                   # (num_out, G)
    gmg = member.T.astype(jnp.float32) * gamma.astype(jnp.float32)[None, :]  # (G, num_out)

    # Batch tile: multiple of 8 sublanes, capped at the (rounded-up) batch size.
    tm = max(8, min(_round_up(tm, 8), _round_up(B, 8)))
    grid = (pl.cdiv(B, tm),)

    # VMEM budget: double-buffered resident weight + params, double-buffered x/out
    # tiles, plus the f32 GroupNorm intermediates; generation-aware cap with headroom.
    w_bytes = wt.size * wt.dtype.itemsize
    param_bytes = (2 * num_out + 2 * num_out * num_groups) * 4
    tile_bytes = tm * num_in * xc.dtype.itemsize + tm * num_out * jnp.dtype(out_dtype).itemsize
    gn_scratch = 5 * tm * num_out * 4
    vmem_needed = 2 * (w_bytes + param_bytes) + 2 * tile_bytes + gn_scratch + (4 << 20)
    cap = _vmem_capacity_bytes()
    vmem_limit = int(min(max(vmem_needed, 16 << 20), cap - (12 << 20)))

    kernel = make_mlp_kernel(float(eps))

    out = pl.pallas_call(
        kernel,
        out_shape=jax.ShapeDtypeStruct((B, num_out), out_dtype),
        grid=grid,
        in_specs=[
            pl.BlockSpec((tm, num_in), lambda i: (i, 0)),          # x tiles stream
            pl.BlockSpec((num_in, num_out), lambda i: (0, 0)),     # weight^T, VMEM-resident
            pl.BlockSpec((1, num_out), lambda i: (0, 0)),          # bias
            pl.BlockSpec((1, num_out), lambda i: (0, 0)),          # beta
            pl.BlockSpec((num_out, num_groups), lambda i: (0, 0)),  # gm (1/cpg-scaled)
            pl.BlockSpec((num_groups, num_out), lambda i: (0, 0)),  # gm^T (gamma-scaled)
        ],
        out_specs=pl.BlockSpec((tm, num_out), lambda i: (i, 0)),   # lane-dense output
        compiler_params=pltpu.CompilerParams(
            dimension_semantics=("parallel",),   # shard batch tiles across TCs
            vmem_limit_bytes=vmem_limit,
        ),
    )(xc, wt, b_row, beta_row, gm_scaled, gmg)

    return out


def mlp_reference(x, weight, bias, gamma, beta, num_groups, eps=1e-5):
    """Pure-JAX reference mirroring PyTorch MLP(act='relu', norm='GN')."""
    B = x.shape[0]
    num_out = weight.shape[0]
    y = x @ weight.T + bias
    yg = y.reshape(B, num_groups, num_out // num_groups)
    mean = yg.mean(axis=-1, keepdims=True)
    var = ((yg - mean) ** 2).mean(axis=-1, keepdims=True)
    yn = ((yg - mean) / jnp.sqrt(var + eps)).reshape(B, num_out)
    out = yn * gamma + beta
    return jnp.maximum(out, 0.0)


if __name__ == "__main__":
    # MLP(num_in=128) -> num_out=128, norm='GN' with gcd(32, 128)=32 groups, act='relu'.
    # Batch 1024 with TM=512 exercises a 2-step pipelined grid with lane-dense output.
    B, num_in = 1024, 128
    num_out = num_in
    num_groups = math.gcd(32, num_out)

    key = jax.random.PRNGKey(0)
    kx, kw, kb, kg, kbeta = jax.random.split(key, 5)

    x = jax.random.normal(kx, (B, num_in), dtype=jnp.float32)
    # deterministic synthetic parameters (not a checkpoint load)
    bound = 1.0 / math.sqrt(num_in)
    weight = jax.random.uniform(kw, (num_out, num_in), jnp.float32, -bound, bound)
    bias = jax.random.uniform(kb, (num_out,), jnp.float32, -bound, bound)
    gamma = 1.0 + 0.1 * jax.random.normal(kg, (num_out,), dtype=jnp.float32)
    beta = 0.1 * jax.random.normal(kbeta, (num_out,), dtype=jnp.float32)

    out = mlp_forward(x, weight, bias, gamma, beta, num_groups, tm=512)
    out = jax.block_until_ready(out)

    # Reference on the same bf16-rounded inputs the kernel consumes (GN math stays f32).
    xr = x.astype(jnp.bfloat16).astype(jnp.float32)
    wr = weight.astype(jnp.bfloat16).astype(jnp.float32)
    ref = mlp_reference(xr, wr, bias, gamma, beta, num_groups)

    assert out.shape == (B, num_out)
    assert out.dtype == x.dtype
    assert jnp.allclose(out, ref, atol=2e-3, rtol=2e-3), "mismatch vs reference"

    print("KERNEL_OK")
</pallas_src>

<mosaic_0001>
module attributes {stable_mosaic.version = 11 : i64} {
  func.func @kernel(%arg0: i32, %arg1: memref<512x128xbf16, #tpu.memory_space<vmem>>, %arg2: memref<128x128xbf16, #tpu.memory_space<vmem>>, %arg3: memref<1x128xf32, #tpu.memory_space<vmem>>, %arg4: memref<1x128xf32, #tpu.memory_space<vmem>>, %arg5: memref<128x32xf32, #tpu.memory_space<vmem>>, %arg6: memref<32x128xf32, #tpu.memory_space<vmem>>, %arg7: memref<512x128xf32, #tpu.memory_space<vmem>>) attributes {dimension_semantics = [#tpu.dimension_semantics<parallel>], iteration_bounds = array<i64: 2>, scalar_prefetch = 0 : i64, scratch_operands = 0 : i64, tpu.core_type = #tpu.core_type<tc>, window_params = [{transform_indices = @transform_0, window_bounds = array<i64: 512, 128>}, {pipeline_mode = #tpu.pipeline_mode<synchronous>, transform_indices = @transform_1, window_bounds = array<i64: 128, 128>}, {pipeline_mode = #tpu.pipeline_mode<synchronous>, transform_indices = @transform_2, window_bounds = array<i64: 1, 128>}, {pipeline_mode = #tpu.pipeline_mode<synchronous>, transform_indices = @transform_3, window_bounds = array<i64: 1, 128>}, {pipeline_mode = #tpu.pipeline_mode<synchronous>, transform_indices = @transform_4, window_bounds = array<i64: 128, 32>}, {pipeline_mode = #tpu.pipeline_mode<synchronous>, transform_indices = @transform_5, window_bounds = array<i64: 32, 128>}, {transform_indices = @transform_6, window_bounds = array<i64: 512, 128>}]} {
    %c0 = arith.constant 0 : index
    %c0_0 = arith.constant 0 : index
    %0 = vector.load %arg1[%c0, %c0_0] : memref<512x128xbf16, #tpu.memory_space<vmem>>, vector<512x128xbf16>
    %c0_1 = arith.constant 0 : index
    %c0_2 = arith.constant 0 : index
    %1 = vector.load %arg2[%c0_1, %c0_2] : memref<128x128xbf16, #tpu.memory_space<vmem>>, vector<128x128xbf16>
    %cst = arith.constant dense<0.000000e+00> : vector<512x128xf32>
    %2 = tpu.matmul %0, %1, %cst {dimension_numbers = #tpu.dot_dimension_numbers<[1], [0], [0], [1], [0, 0, 1, 1], [], []>} : vector<512x128xbf16>, vector<128x128xbf16>, vector<512x128xf32> -> vector<512x128xf32>
    %c0_3 = arith.constant 0 : index
    %c0_4 = arith.constant 0 : index
    %3 = vector.load %arg3[%c0_3, %c0_4] : memref<1x128xf32, #tpu.memory_space<vmem>>, vector<1x128xf32>
    %4 = vector.broadcast %3 : vector<1x128xf32> to vector<512x128xf32>
    %5 = arith.addf %2, %4 : vector<512x128xf32>
    %c0_5 = arith.constant 0 : index
    %c0_6 = arith.constant 0 : index
    %6 = vector.load %arg5[%c0_5, %c0_6] : memref<128x32xf32, #tpu.memory_space<vmem>>, vector<128x32xf32>
    %c0_7 = arith.constant 0 : index
    %c0_8 = arith.constant 0 : index
    %7 = vector.load %arg6[%c0_7, %c0_8] : memref<32x128xf32, #tpu.memory_space<vmem>>, vector<32x128xf32>
    %cst_9 = arith.constant dense<0.000000e+00> : vector<512x32xf32>
    %8 = tpu.matmul %5, %6, %cst_9 {dimension_numbers = #tpu.dot_dimension_numbers<[1], [0], [0], [1], [0, 0, 1, 1], [], []>} : vector<512x128xf32>, vector<128x32xf32>, vector<512x32xf32> -> vector<512x32xf32>
    %9 = arith.mulf %5, %5 : vector<512x128xf32>
    %cst_10 = arith.constant dense<0.000000e+00> : vector<512x32xf32>
    %10 = tpu.matmul %9, %6, %cst_10 {dimension_numbers = #tpu.dot_dimension_numbers<[1], [0], [0], [1], [0, 0, 1, 1], [], []>} : vector<512x128xf32>, vector<128x32xf32>, vector<512x32xf32> -> vector<512x32xf32>
    %11 = arith.mulf %8, %8 : vector<512x32xf32>
    %12 = arith.subf %10, %11 : vector<512x32xf32>
    %cst_11 = arith.constant 9.99999974E-6 : f32
    %13 = vector.broadcast %cst_11 : f32 to vector<512x32xf32>
    %14 = arith.addf %12, %13 : vector<512x32xf32>
    %15 = math.rsqrt %14 : vector<512x32xf32>
    %cst_12 = arith.constant dense<0.000000e+00> : vector<512x128xf32>
    %16 = tpu.matmul %15, %7, %cst_12 {dimension_numbers = #tpu.dot_dimension_numbers<[1], [0], [0], [1], [0, 0, 1, 1], [], []>} : vector<512x32xf32>, vector<32x128xf32>, vector<512x128xf32> -> vector<512x128xf32>
    %17 = arith.mulf %8, %15 : vector<512x32xf32>
    %cst_13 = arith.constant dense<0.000000e+00> : vector<512x128xf32>
    %18 = tpu.matmul %17, %7, %cst_13 {dimension_numbers = #tpu.dot_dimension_numbers<[1], [0], [0], [1], [0, 0, 1, 1], [], []>} : vector<512x32xf32>, vector<32x128xf32>, vector<512x128xf32> -> vector<512x128xf32>
    %19 = arith.mulf %5, %16 : vector<512x128xf32>
    %c0_14 = arith.constant 0 : index
    %c0_15 = arith.constant 0 : index
    %20 = vector.load %arg4[%c0_14, %c0_15] : memref<1x128xf32, #tpu.memory_space<vmem>>, vector<1x128xf32>
    %21 = vector.broadcast %20 : vector<1x128xf32> to vector<512x128xf32>
    %22 = arith.subf %21, %18 : vector<512x128xf32>
    %23 = arith.addf %19, %22 : vector<512x128xf32>
    %cst_16 = arith.constant 0.000000e+00 : f32
    %24 = vector.broadcast %cst_16 : f32 to vector<512x128xf32>
    %25 = arith.maximumf %23, %24 : vector<512x128xf32>
    %c0_17 = arith.constant 0 : index
    %c0_18 = arith.constant 0 : index
    %26 = vector.load %arg7[%c0_17, %c0_18] : memref<512x128xf32, #tpu.memory_space<vmem>>, vector<512x128xf32>
    tpu.vector_store %arg7[%c0_17, %c0_18], %25 {strides = array<i32>} : memref<512x128xf32, #tpu.memory_space<vmem>>, vector<512x128xf32>,
    return
  }
  func.func @transform_0(%arg0: i32) -> (i32, i32) {
    %c0_i32 = arith.constant 0 : i32
    %c0_i32_0 = arith.constant 0 : i32
    return %arg0, %c0_i32 : i32, i32
  }
  func.func @transform_1(%arg0: i32) -> (i32, i32) {
    %c0_i32 = arith.constant 0 : i32
    %c0_i32_0 = arith.constant 0 : i32
    %c0_i32_1 = arith.constant 0 : i32
    return %c0_i32, %c0_i32_0 : i32, i32
  }
  func.func @transform_2(%arg0: i32) -> (i32, i32) {
    %c0_i32 = arith.constant 0 : i32
    %c0_i32_0 = arith.constant 0 : i32
    %c0_i32_1 = arith.constant 0 : i32
    return %c0_i32, %c0_i32_0 : i32, i32
  }
  func.func @transform_3(%arg0: i32) -> (i32, i32) {
    %c0_i32 = arith.constant 0 : i32
    %c0_i32_0 = arith.constant 0 : i32
    %c0_i32_1 = arith.constant 0 : i32
    return %c0_i32, %c0_i32_0 : i32, i32
  }
  func.func @transform_4(%arg0: i32) -> (i32, i32) {
    %c0_i32 = arith.constant 0 : i32
    %c0_i32_0 = arith.constant 0 : i32
    %c0_i32_1 = arith.constant 0 : i32
    return %c0_i32, %c0_i32_0 : i32, i32
  }
  func.func @transform_5(%arg0: i32) -> (i32, i32) {
    %c0_i32 = arith.constant 0 : i32
    %c0_i32_0 = arith.constant 0 : i32
    %c0_i32_1 = arith.constant 0 : i32
    return %c0_i32, %c0_i32_0 : i32, i32
  }
  func.func @transform_6(%arg0: i32) -> (i32, i32) {
    %c0_i32 = arith.constant 0 : i32
    %c0_i32_0 = arith.constant 0 : i32
    return %arg0, %c0_i32 : i32, i32
  }
}

</mosaic_0001>

<bundles_post_ra>
// kernel: tpu_custom_call.1
= control target key start
LH: loop header
LB: loop body
LE: loop exit
PB: predicated region body
PF: predicated region fallthrough
CT: control target
= control target key end

     0   :  { %11 = vsyncpa [#allocation3], 0  ;;  %s6447_s0 = inlined_call_operand.hbm [shape: bf16[1024,128], index: 0, kind: input, shape index: {}]   ;;  %s6448_s1 = inlined_call_operand.vmem [shape: bf16[128,128], index: 1, kind: input, shape index: {}]   ;;  %s6449_s2 = inlined_call_operand.vmem [shape: f32[1,128], index: 2, kind: input, shape index: {}]   ;;  %s6450_s3 = inlined_call_operand.vmem [shape: f32[1,128], index: 3, kind: input, shape index: {}]   ;;  %s6451_s4 = inlined_call_operand.vmem [shape: f32[128,32], index: 4, kind: input, shape index: {}]   ;;  %s6452_s5 = inlined_call_operand.vmem [shape: f32[32,128], index: 5, kind: input, shape index: {}]   ;;  %s6453_s6 = inlined_call_operand.hbm [shape: f32[1024,128], index: 6, kind: output, shape index: {}]  }
   0x1   :  { %13 = vsyncpa [#allocation3 + $0x1], 0 }
   0x2   :  { %14 = vsyncpa [#allocation4], 0 }
   0x3   :  { %16 = vsyncpa [#allocation4 + $0x1], 0  ;;  %s5151_s21 = smov 0   ;;  %s5153_s22 = smov 0  }
   0x4   :  { %s5155_s23 = smov 0   ;;  %s5157_s24 = smov 0  }
   0x5 LB: > { %s5172_s25 = sadd.s32 4294967295, %s5108_s24   ;;  %s3632_s26 = sadd.s32 4294967294, %s5108_s24   ;;  %s5108_s24 = sphi %s5157_s24, %s6550_s24   ;;  %s5104_s23 = sphi %s5155_s23, %s6549_s23   ;;  %s5100_s22 = sphi %s5153_s22, %s6548_s22   ;;  %s5096_s21 = sphi %s5151_s21, %s6547_s21  }
   0x6   : > { %s5176_s27 = sadd.s32 1, %s5108_s24   ;;  %s29_s28 = sadd.s32 1, %s5104_s23 }
   0x7   : > { %s26_s29 = ssub.s32 %s5108_s24, %s5176_s27  ;;  %p36_p0 = scmp.ne.s32.totalorder %s5104_s23, %s5100_s22 }
   0x8   : > { %p27_p1 = scmp.eq.s32.totalorder %s26_s29, 0  ;;  %p37_p2 = scmp.eq.s32.totalorder %s5108_s24, 0 }
   0x9   : > { %p42_p3 = scmp.ne.s32.totalorder %s5100_s22, %s5096_s21  ;;  %p43_p4 = scmp.eq.s32.totalorder %s5172_s25, 0 }
   0xa   : > { %s5188_s30 = scalar_select %p27_p1, %s5104_s23, %s29_s28  }
   0xb   : > { %p5190_p5 = por %p37_p2, %p36_p0  ;;  %p5194_p6 = por %p43_p4, %p42_p3 }
   0xc   : > { %p171_p7 = scmp.eq.s32.totalorder %s5172_s25, 1  ;;  %p177_p8 = scmp.eq.s32.totalorder %s3632_s26, 1 }
   0xd   : > { %p4806_p10 = scmp.lt.s32.totalorder %s5108_s24, 2  ;;  %s212_s11 = sand.u32 1, %s5104_s23  }
   0xe   : > { %p5201_p11 = por %p171_p7, %p36_p0  ;;  %p5205_p12 = por %p177_p8, %p42_p3 }
   0xf   : > { %s3816_s12 = sshll.u32 %s5108_s24, 12  ;;  %s3635_s13 = sshll.u32 %s212_s11, 8 }
  0x10   : > { %s6485_s9 = scalar_select %p5201_p11, 1, 0 }
  0x11   : > { %s6486_s10 = scalar_select %p5205_p12, 1, 0 }
  0x12   : > { %s5214_s16 = scalar_lea.hbm %s6447_s0, %s3816_s12  ;;  %s216_s17 = scalar_lea.vmem [#allocation2], %s3635_s13 }
  0x13   : > { %s223_s18 = sshll.u32 %s216_s17, 4  ;;  %p5218_p13 = pnand %p4806_p10, %p5190_p5  ;;  %s5222_s18 = int_to_ptr.vmem [resolvable:$true] %s223_s18 }
  0x14   : > { %s5224_s20 = scalar_lea.sflag [#allocation3], %s212_s11  ;;  %s5012_s26 = scalar_lea.hbm %s5214_s16, 4096 }
  0x15   : > { %p5013_p0 = scmp.ne.s32.totalorder %s5214_s16, %s5012_s26  ;;  %p5014_p1 = pneg %p5218_p13 }
  0x16   : > { %s5017_s7 = scalar_lea.hbm %s6447_s0, 8192  ;;  %p5018_p4 = scmp.lt.u32.totalorder %s5214_s16, %s6447_s0 }
  0x17   : > { %p5015_p2 = pnand %p5014_p1, %p5013_p0  ;;  %p5019_p5 = scmp.lt.u32.totalorder %s5017_s7, %s5012_s26 }
  0x18   : > { %p5021_p8 = scmp.lt.u32.totalorder %s5012_s26, %s5214_s16 }
  0x19   : > { %p5016_p3 = pneg %p5015_p2  ;;  %p5020_p7 = por %p5019_p5, %p5018_p4 }
  0x1b   : > { %p5022_p10 = por %p5021_p8, %p5020_p7 }
  0x1d   : > { %p5023_p9 = pnand %p5022_p10, %p5016_p3 }
  0x1f   : > { %5026 = shalt.err (!%p5023_p9)
}
  0x20   : > { %s5027_s11 = scalar_lea.vmem %s5222_s18, 4096  ;;  %s5110_s14 = smov [#allocation2]  }
  0x21   : > { %p5028_p0 = scmp.ne.s32.totalorder %s5222_s18, %s5027_s11  ;;  %s5032_s15 = sshll.u32 %s5110_s14, 4  ;;  %s5033_s15 = int_to_ptr.vmem [resolvable:$false] %s5032_s15 }
  0x22   : > { %s5034_s17 = scalar_lea.vmem %s5033_s15, 8192  ;;  %p5035_p11 = scmp.lt.s32.totalorder %s5222_s18, %s5033_s15 }
  0x23   : > { %p5030_p2 = pnand %p5028_p0, %p5014_p1  ;;  %p5036_p4 = scmp.lt.s32.totalorder %s5034_s17, %s5027_s11 }
  0x25   : > { %p5031_p12 = pneg %p5030_p2  ;;  %p5037_p5 = por %p5036_p4, %p5035_p11 }
  0x27   : > { %p5038_p7 = pnand %p5037_p5, %p5031_p12 }
  0x29   : > { %5041 = shalt.err (!%p5038_p7)
}
  0x2a   : > { %s5111_s26 = smov 64   ;;  %s5112_s28 = smov 4  }
  0x2b   : > { %4801 = dma.hbm_to_vmem [thread:$0]  (!%p5218_p13), %s5214_s16, 4096, %s5222_s18, %s5224_s20, %s5111_s26, %s5111_s26, %s5112_s28  }
  0x2c   : > { %p3638_p9 = scmp.ge.s32.totalorder %s5108_s24, 1  ;;  %p231_p1 = scmp.lt.s32.totalorder %s5108_s24, 3 }
  0x2e   : > { %p232_p3 = pnand %p3638_p9, %p231_p1 }
  0x30   : > { %235 = sbr.rel (%p232_p3) target bundleno = 900 (0x384), region = 44 }
  0x37   : > { %s5255_s29 = sand.u32 1, %s5100_s22  }
  0x38   : > { %s3639_s7 = sshll.u32 %s5255_s29, 8  ;;  %s238_s12 = scalar_lea.sflag [#allocation3], %s5255_s29 }
  0x39   : > { %s5259_s13 = scalar_lea.vmem [#allocation2], %s3639_s7 }
  0x3a   : > { %5087 = dma.done.wait (%p5194_p6), %s238_s12, 4096  }
  0x3b   : > { %5089 = vsyncadd (%p5194_p6), %s238_s12, 4294963200  ;;  %v4844_v0 = vld [vmem:[%s6448_s1] sm:$0xff]   ;;  %v4845_v1 = vld [vmem:[%s6448_s1 + $0x8] sm:$0xff]   ;;  %vm1999_vm0 = vcmask 261120   ;;  %s3640_s15 = sshll.u32 %s5255_s29, 9  ;;  %s3817_s26 = sshll.u32 %s5172_s25, 13 }
  0x3c   : > { %4154 = vmatprep.subr.bf16.mxu0 %v4844_v0  ;;  %4778 = vmatprep.subr.bf16.mxu1 %v4844_v0  ;;  %v4846_v2 = vld [vmem:[%s6448_s1 + $0x10] sm:$0xff]   ;;  %v4847_v3 = vld [vmem:[%s6448_s1 + $0x18] sm:$0xff]   ;;  %v4852_v4 = vld [vmem:[%s5259_s13] sm:$0xff]   ;;  %s6210_s17 = scalar_lea.vmem [#allocation5], %s3640_s15  ;;  %s6399_s16 = scalar_lea.hbm %s6453_s6, %s3817_s26 }
  0x3d   : > { %4155 = vmatpush3.bf16.msra.mxu0 %v4844_v0  ;;  %4786 = vmatpush3.bf16.msra.mxu1 %v4844_v0  ;;  %v4848_v5 = vld [vmem:[%s6448_s1 + $0x20] sm:$0xff]   ;;  %v4849_v6 = vld [vmem:[%s6448_s1 + $0x28] sm:$0xff]   ;;  %v4850_v7 = vld [vmem:[%s6448_s1 + $0x30] sm:$0xff]   ;;  %s3559_s28 = sshll.u32 %s6210_s17, 4  ;;  %s3546_s25 = scalar_lea.sflag [#allocation4], %s5255_s29  ;;  %s6401_s28 = int_to_ptr.vmem [resolvable:$true] %s3559_s28 }
  0x3e   : > { %4156 = vmatprep.subr.bf16.mxu0 %v4845_v1  ;;  %4779 = vmatprep.subr.bf16.mxu1 %v4845_v1  ;;  %v4851_v8 = vld [vmem:[%s6448_s1 + $0x38] sm:$0xff]   ;;  %v4868_v9 = vld [vmem:[%s5259_s13 + $0x80] sm:$0xff]   ;;  %v4853_v10 = vld [vmem:[%s5259_s13 + $0x8] sm:$0xff]   ;;  %s5042_s18 = scalar_lea.vmem %s6401_s28, 8192  ;;  %p6544_p11 = scmp.ne.s32.totalorder %s6485_s9, 0 }
  0x3f   : > { %4170 = vmatprep.mubr.bf16.mxu0 %v4852_v4  ;;  %4202 = vmatprep.mubr.bf16.mxu1 %v4868_v9  ;;  %v4854_v11 = vld [vmem:[%s5259_s13 + $0x10] sm:$0xff]   ;;  %v4869_v12 = vld [vmem:[%s5259_s13 + $0x88] sm:$0xff]   ;;  %v4855_v14 = vld [vmem:[%s5259_s13 + $0x18] sm:$0xff]   ;;  %p5043_p6 = scmp.ne.s32.totalorder %s6401_s28, %s5042_s18 }
  0x40   : > { %v4870_v13 = vld [vmem:[%s5259_s13 + $0x90] sm:$0xff]   ;;  %v4856_v15 = vld [vmem:[%s5259_s13 + $0x20] sm:$0xff]   ;;  %v4871_v16 = vld [vmem:[%s5259_s13 + $0x98] sm:$0xff]  }
  0x41   : > { %4157 = vmatpush3.bf16.msra.mxu0 %v4845_v1  ;;  %4787 = vmatpush3.bf16.msra.mxu1 %v4845_v1  ;;  %v4872_v17 = vld [vmem:[%s5259_s13 + $0xa0] sm:$0xff]   ;;  %v890_v19 = vld [vmem:[%s6451_s4 + $0x8] sm:$0xff]  ;;  %v891_v20 = vld [vmem:[%s6451_s4 + $0x10] sm:$0xff]  ;;  %p5044_p12 = pnand %p5043_p6, %p6544_p11 }
  0x42   : > { %4158 = vmatprep.subr.bf16.mxu0 %v4846_v2  ;;  %4780 = vmatprep.subr.bf16.mxu1 %v4846_v2  ;;  %v889_v18 = vld [vmem:[%s6451_s4] sm:$0xff]  ;;  %v892_v22 = vld [vmem:[%s6451_s4 + $0x18] sm:$0xff]  ;;  %v894_v25 = vld [vmem:[%s6451_s4 + $0x28] sm:$0xff] }
  0x43   : > { %v4698_v21 = vpack.c.bf16 %v890_v19, %v889_v18  ;;  %v4702_v23 = vpack.c.bf16 %v892_v22, %v891_v20  ;;  %v893_v24 = vld [vmem:[%s6451_s4 + $0x20] sm:$0xff]  ;;  %v4857_v26 = vld [vmem:[%s5259_s13 + $0x28] sm:$0xff]   ;;  %v4858_v27 = vld [vmem:[%s5259_s13 + $0x30] sm:$0xff]   ;;  %p5045_p13 = pneg %p5044_p12 }
  0x44   : > { %v4873_v28 = vld [vmem:[%s5259_s13 + $0xa8] sm:$0xff]   ;;  %v4874_v29 = vld [vmem:[%s5259_s13 + $0xb0] sm:$0xff]   ;;  %v896_v31 = vld [vmem:[%s6451_s4 + $0x38] sm:$0xff]  ;;  %v4706_v32 = vpack.c.bf16 %v894_v25, %v893_v24 }
  0x45   : > { %4159 = vmatpush3.bf16.msra.mxu0 %v4846_v2  ;;  %4788 = vmatpush3.bf16.msra.mxu1 %v4846_v2  ;;  %v895_v30 = vld [vmem:[%s6451_s4 + $0x30] sm:$0xff]  ;;  %v897_v34 = vld [vmem:[%s6451_s4 + $0x40] sm:$0xff]  ;;  %v898_v35 = vld [vmem:[%s6451_s4 + $0x48] sm:$0xff] }
  0x46   : > { %4160 = vmatprep.subr.bf16.mxu0 %v4847_v3  ;;  %4781 = vmatprep.subr.bf16.mxu1 %v4847_v3  ;;  %v4710_v33 = vpack.c.bf16 %v896_v31, %v895_v30  ;;  %v4859_v36 = vld [vmem:[%s5259_s13 + $0x38] sm:$0xff]   ;;  %v4860_v37 = vld [vmem:[%s5259_s13 + $0x40] sm:$0xff]   ;;  %v899_v40 = vld [vmem:[%s6451_s4 + $0x50] sm:$0xff]  ;;  %v4714_v42 = vpack.c.bf16 %v898_v35, %v897_v34 }
  0x47   : > { %v4875_v38 = vld [vmem:[%s5259_s13 + $0xb8] sm:$0xff]   ;;  %v4876_v39 = vld [vmem:[%s5259_s13 + $0xc0] sm:$0xff]   ;;  %v902_v45 = vld [vmem:[%s6451_s4 + $0x68] sm:$0xff] }
  0x48   : > { %v900_v41 = vld [vmem:[%s6451_s4 + $0x58] sm:$0xff]  ;;  %v901_v44 = vld [vmem:[%s6451_s4 + $0x60] sm:$0xff]  ;;  %v4861_v46 = vld [vmem:[%s5259_s13 + $0x48] sm:$0xff]  }
  0x49   : > { %4161 = vmatpush3.bf16.msra.mxu0 %v4847_v3  ;;  %4789 = vmatpush3.bf16.msra.mxu1 %v4847_v3  ;;  %v4718_v43 = vpack.c.bf16 %v900_v41, %v899_v40  ;;  %v4862_v47 = vld [vmem:[%s5259_s13 + $0x50] sm:$0xff]   ;;  %v4877_v48 = vld [vmem:[%s5259_s13 + $0xc8] sm:$0xff]   ;;  %v904_v51 = vld [vmem:[%s6451_s4 + $0x78] sm:$0xff]  ;;  %v4722_v52 = vpack.c.bf16 %v902_v45, %v901_v44 }
  0x4a   : > { %4162 = vmatprep.subr.bf16.mxu0 %v4848_v5  ;;  %4782 = vmatprep.subr.bf16.mxu1 %v4848_v5  ;;  %v4878_v49 = vld [vmem:[%s5259_s13 + $0xd0] sm:$0xff]   ;;  %v4863_v54 = vld [vmem:[%s5259_s13 + $0x58] sm:$0xff]   ;;  %v4864_v56 = vld [vmem:[%s5259_s13 + $0x60] sm:$0xff]  }
  0x4b   : > { %v903_v50 = vld [vmem:[%s6451_s4 + $0x70] sm:$0xff]  ;;  %v4879_v55 = vld [vmem:[%s5259_s13 + $0xd8] sm:$0xff]   ;;  %v4880_v57 = vld [vmem:[%s5259_s13 + $0xe0] sm:$0xff]  }
  0x4c   : > { %v4726_v53 = vpack.c.bf16 %v904_v51, %v903_v50  ;;  %v4865_v58 = vld [vmem:[%s5259_s13 + $0x68] sm:$0xff]   ;;  %v4866_v60 = vld [vmem:[%s5259_s13 + $0x70] sm:$0xff]   ;;  %v4867_v62 = vld [vmem:[%s5259_s13 + $0x78] sm:$0xff]  }
  0x4d   : > { %4163 = vmatpush3.bf16.msra.mxu0 %v4848_v5  ;;  %4790 = vmatpush3.bf16.msra.mxu1 %v4848_v5  ;;  %v4881_v59 = vld [vmem:[%s5259_s13 + $0xe8] sm:$0xff]   ;;  %v4882_v61 = vld [vmem:[%s5259_s13 + $0xf0] sm:$0xff]   ;;  %v4883_v63 = vld [vmem:[%s5259_s13 + $0xf8] sm:$0xff]   ;;  %s5113_s13 = smov [#allocation5]  }
  0x4e   : > { %4164 = vmatprep.subr.bf16.mxu0 %v4849_v6  ;;  %4783 = vmatprep.subr.bf16.mxu1 %v4849_v6  ;;  %v905_v0 = vld [vmem:[%s6452_s5] sm:$0xff]  ;;  %v906_v1 = vld [vmem:[%s6452_s5 + $0x8] sm:$0xff]  ;;  %v907_v19 = vld [vmem:[%s6452_s5 + $0x10] sm:$0xff]  ;;  %s5046_s19 = sshll.u32 %s5113_s13, 4  ;;  %s5047_s19 = int_to_ptr.vmem [resolvable:$false] %s5046_s19 }
  0x4f   : > { %v4762_v2 = vpack.c.bf16 %v906_v1, %v905_v0  ;;  %v5378_v3 = vld [vmem:[%s6449_s2] ss:$0 sm:$0xff]  ;;  %v908_v20 = vld [vmem:[%s6452_s5 + $0x18] sm:$0xff]  ;;  %s5048_s20 = scalar_lea.vmem %s5047_s19, 16384  ;;  %p5049_p8 = scmp.lt.s32.totalorder %s6401_s28, %s5047_s19 }
  0x50   : > { %p5050_p10 = scmp.lt.s32.totalorder %s5048_s20, %s5042_s18 }
  0x51   : > { %4165 = vmatpush3.bf16.msra.mxu0 %v4849_v6  ;;  %4791 = vmatpush3.bf16.msra.mxu1 %v4849_v6 }
  0x52   : > { %4166 = vmatprep.subr.bf16.mxu0 %v4850_v7  ;;  %4784 = vmatprep.subr.bf16.mxu1 %v4850_v7  ;;  %p5051_p0 = por %p5050_p10, %p5049_p8 }
  0x54   : > { %p5052_p2 = pnand %p5051_p0, %p5045_p13 }
  0x55   : > { %4167 = vmatpush3.bf16.msra.mxu0 %v4850_v7  ;;  %4792 = vmatpush3.bf16.msra.mxu1 %v4850_v7 }
  0x56   : > { %4168 = vmatprep.subr.bf16.mxu0 %v4851_v8  ;;  %4785 = vmatprep.subr.bf16.mxu1 %v4851_v8 }
  0x59   : > { %4169 = vmatpush3.bf16.msra.mxu0 %v4851_v8  ;;  %4793 = vmatpush3.bf16.msra.mxu1 %v4851_v8 }
  0x5a   : > { %4699 = vmatprep.subr.bf16.mxu1 %v4698_v21  ;;  %4731 = vmatprep.subr.bf16.mxu0 %v4698_v21 }
  0x5c   : > { %4171 = vmatmul.mubr.bf16.vlgmr.msra.gmra.mrb[0].mxu0 %v4853_v10  ;;  %4203 = vmatmul.mubr.bf16.vlgmr.msra.gmra.mrb[0].mxu1 %v4869_v12 }
  0x5d   : > { %4174 = vmatprep.mubr.bf16.mxu0 %v4854_v11  ;;  %4206 = vmatprep.mubr.bf16.mxu1 %v4870_v13 }
  0x5e   : > { %4701 = vmatpush3.bf16.msra.mxu1 %v4698_v21  ;;  %4733 = vmatpush3.bf16.msra.mxu0 %v4698_v21  ;;  %v4766_v21 = vpack.c.bf16 %v908_v20, %v907_v19 }
  0x5f   : > { %4703 = vmatprep.subr.bf16.mxu1 %v4702_v23  ;;  %4735 = vmatprep.subr.bf16.mxu0 %v4702_v23 }
  0x62   : > { %4705 = vmatpush3.bf16.msra.mxu1 %v4702_v23  ;;  %4737 = vmatpush3.bf16.msra.mxu0 %v4702_v23 }
  0x63   : > { %4707 = vmatprep.subr.bf16.mxu1 %v4706_v32  ;;  %4739 = vmatprep.subr.bf16.mxu0 %v4706_v32 }
  0x64   : > { %4175 = vmatmul.mubr.bf16.gmra.mrb[4].mxu0 %v4855_v14  ;;  %4207 = vmatmul.mubr.bf16.gmra.mrb[4].mxu1 %v4871_v16 }
  0x65   : > { %4178 = vmatprep.mubr.bf16.mxu0 %v4856_v15  ;;  %4210 = vmatprep.mubr.bf16.mxu1 %v4872_v17 }
  0x66   : > { %4709 = vmatpush3.bf16.msra.mxu1 %v4706_v32  ;;  %4741 = vmatpush3.bf16.msra.mxu0 %v4706_v32 }
  0x67   : > { %4711 = vmatprep.subr.bf16.mxu1 %v4710_v33  ;;  %4743 = vmatprep.subr.bf16.mxu0 %v4710_v33 }
  0x6a   : > { %4713 = vmatpush3.bf16.msra.mxu1 %v4710_v33  ;;  %4745 = vmatpush3.bf16.msra.mxu0 %v4710_v33 }
  0x6b   : > { %4715 = vmatprep.subr.bf16.mxu1 %v4714_v42  ;;  %4747 = vmatprep.subr.bf16.mxu0 %v4714_v42 }
  0x6c   : > { %4179 = vmatmul.mubr.bf16.gmra.mrb[8].mxu0 %v4857_v26  ;;  %4211 = vmatmul.mubr.bf16.gmra.mrb[8].mxu1 %v4873_v28 }
  0x6d   : > { %4182 = vmatprep.mubr.bf16.mxu0 %v4858_v27  ;;  %4214 = vmatprep.mubr.bf16.mxu1 %v4874_v29 }
  0x6e   : > { %4717 = vmatpush3.bf16.msra.mxu1 %v4714_v42  ;;  %4749 = vmatpush3.bf16.msra.mxu0 %v4714_v42 }
  0x6f   : > { %4719 = vmatprep.subr.bf16.mxu1 %v4718_v43  ;;  %4751 = vmatprep.subr.bf16.mxu0 %v4718_v43 }
  0x72   : > { %4721 = vmatpush3.bf16.msra.mxu1 %v4718_v43  ;;  %4753 = vmatpush3.bf16.msra.mxu0 %v4718_v43 }
  0x73   : > { %4723 = vmatprep.subr.bf16.mxu1 %v4722_v52  ;;  %4755 = vmatprep.subr.bf16.mxu0 %v4722_v52 }
  0x74   : > { %4183 = vmatmul.mubr.bf16.gmra.mrb[12].mxu0 %v4859_v36  ;;  %4215 = vmatmul.mubr.bf16.gmra.mrb[12].mxu1 %v4875_v38 }
  0x75   : > { %4186 = vmatprep.mubr.bf16.mxu0 %v4860_v37  ;;  %4218 = vmatprep.mubr.bf16.mxu1 %v4876_v39 }
  0x76   : > { %4725 = vmatpush3.bf16.msra.mxu1 %v4722_v52  ;;  %4757 = vmatpush3.bf16.msra.mxu0 %v4722_v52 }
  0x77   : > { %4727 = vmatprep.subr.bf16.mxu1 %v4726_v53  ;;  %4759 = vmatprep.subr.bf16.mxu0 %v4726_v53 }
  0x7a   : > { %4729 = vmatpush3.bf16.msra.mxu1 %v4726_v53  ;;  %4761 = vmatpush3.bf16.msra.mxu0 %v4726_v53 }
  0x7b   : > { %4763 = vmatprep.subr.bf16.mxu1 %v4762_v2  ;;  %4771 = vmatprep.subr.bf16.mxu0 %v4762_v2 }
  0x7c   : > { %4187 = vmatmul.mubr.bf16.gmra.mrb[16].mxu0 %v4861_v46  ;;  %4219 = vmatmul.mubr.bf16.gmra.mrb[16].mxu1 %v4877_v48 }
  0x7d   : > { %4190 = vmatprep.mubr.bf16.mxu0 %v4862_v47  ;;  %4222 = vmatprep.mubr.bf16.mxu1 %v4878_v49 }
  0x84   : > { %4191 = vmatmul.mubr.bf16.gmra.mrb[20].mxu0 %v4863_v54  ;;  %4223 = vmatmul.mubr.bf16.gmra.mrb[20].mxu1 %v4879_v55 }
  0x85   : > { %4194 = vmatprep.mubr.bf16.mxu0 %v4864_v56  ;;  %4226 = vmatprep.mubr.bf16.mxu1 %v4880_v57 }
  0x8c   : > { %4195 = vmatmul.mubr.bf16.gmra.mrb[24].mxu0 %v4865_v58  ;;  %4227 = vmatmul.mubr.bf16.gmra.mrb[24].mxu1 %v4881_v59 }
  0x8d   : > { %4198 = vmatprep.mubr.bf16.mxu0 %v4866_v60  ;;  %4230 = vmatprep.mubr.bf16.mxu1 %v4882_v61 }
  0x94   : > { %4199 = vmatmul.mubr.bf16.gmra.mrb[28].mxu0 %v4867_v62  ;;  %4231 = vmatmul.mubr.bf16.gmra.mrb[28].mxu1 %v4883_v63 }
 0x12f   : > { %v4172_v4 = vpop.f32.mrb[0].mxu0  ;;  %v4204_v5 = vpop.f32.mrb[0].mxu1 }
 0x130   : > { %v634_v6 = vpop.f32.mrb[1].mxu0  ;;  %v5381_v7 = vadd.f32 %v4204_v5, %v5378_v3  ;;  %v5383_v8 = vpop.f32.mrb[1].mxu1  ;;  %v5389_v12 = vadd.f32 %v4172_v4, %v5378_v3 }
 0x131   : > { %v5386_v9 = vadd.f32 %v5378_v3, %v634_v6  ;;  %v4173_v10 = vpop.f32.mrb[2].mxu0  ;;  %v4205_v11 = vpop.f32.mrb[2].mxu1 }
 0x132   : > { %v637_v13 = vpop.f32.mrb[3].mxu0  ;;  %v5392_v14 = vadd.f32 %v4205_v11, %v5378_v3  ;;  %v765_v15 = vpop.f32.mrb[3].mxu1  ;;  %v5410_v22 = vadd.f32 %v4173_v10, %v5378_v3  ;;  %v1296_v24 = vmul.f32 %v5389_v12, %v5389_v12 }
 0x133   : > { %v5395_v16 = vadd.f32 %v5378_v3, %v637_v13  ;;  %4266 = vmatprep.mubr.f32.mxu1 %v5386_v9  ;;  %v1294_v17 = vmul.f32 %v5386_v9, %v5386_v9  ;;  %v5401_v18 = vadd.f32 %v5378_v3, %v765_v15 }
 0x134   : > { %v1297_v32 = vmul.f32 %v5410_v22, %v5410_v22 }
 0x135   : > { %v1295_v23 = vmul.f32 %v5395_v16, %v5395_v16  ;;  %4267 = vmatmul.mubr.f32.vlgmr.msra.gmra.mrb[32].mxu1 %v5395_v16  ;;  %4394 = vmatprep.mubr.f32.mxu0 %v1294_v17 }
 0x136   : > { %4269 = vmatprep.mubr.f32.mxu1 %v5389_v12  ;;  %4765 = vmatpush3.bf16.msra.mxu1 %v4762_v2 }
 0x137   : > { %v4176_v25 = vpop.f32.mrb[4].mxu0  ;;  %4395 = vmatmul.mubr.f32.vlgmr.msra.gmra.mrb[32].mxu0 %v1295_v23  ;;  %v4208_v26 = vpop.f32.mrb[4].mxu1  ;;  %4767 = vmatprep.subr.bf16.mxu1 %v4766_v21 }
 0x138   : > { %v650_v27 = vpop.f32.mrb[5].mxu0  ;;  %4397 = vmatprep.mubr.f32.mxu0 %v1296_v24  ;;  %v5419_v28 = vadd.f32 %v4208_v26, %v5378_v3  ;;  %v778_v29 = vpop.f32.mrb[5].mxu1  ;;  %4773 = vmatpush3.bf16.msra.mxu0 %v4762_v2  ;;  %v5431_v35 = vadd.f32 %v4176_v25, %v5378_v3 }
 0x139   : > { %v5422_v30 = vadd.f32 %v5378_v3, %v650_v27  ;;  %v4177_v31 = vpop.f32.mrb[6].mxu0  ;;  %4270 = vmatmul.mubr.f32.gmra.mrb[34].mxu1 %v5410_v22  ;;  %v5428_v33 = vadd.f32 %v5378_v3, %v778_v29  ;;  %v4209_v34 = vpop.f32.mrb[6].mxu1  ;;  %4775 = vmatprep.subr.bf16.mxu0 %v4766_v21 }
 0x13a   : > { %v653_v36 = vpop.f32.mrb[7].mxu0  ;;  %v5434_v37 = vadd.f32 %v4209_v34, %v5378_v3  ;;  %v781_v38 = vpop.f32.mrb[7].mxu1  ;;  %4769 = vmatpush3.bf16.msra.mxu1 %v4766_v21  ;;  %v5446_v42 = vadd.f32 %v4177_v31, %v5378_v3  ;;  %v1300_v44 = vmul.f32 %v5431_v35, %v5431_v35 }
 0x13b   : > { %v5437_v39 = vadd.f32 %v5378_v3, %v653_v36  ;;  %4272 = vmatprep.mubr.f32.mxu1 %v5422_v30  ;;  %4398 = vmatmul.mubr.f32.gmra.mrb[34].mxu0 %v1297_v32  ;;  %v1298_v40 = vmul.f32 %v5422_v30, %v5422_v30  ;;  %v5443_v41 = vadd.f32 %v5378_v3, %v781_v38 }
 0x13c   : > { %4777 = vmatpush3.bf16.msra.mxu0 %v4766_v21  ;;  %v1301_v52 = vmul.f32 %v5446_v42, %v5446_v42 }
 0x13d   : > { %4273 = vmatmul.mubr.f32.gmra.mrb[36].mxu1 %v5437_v39  ;;  %4400 = vmatprep.mubr.f32.mxu0 %v1298_v40  ;;  %v1299_v43 = vmul.f32 %v5437_v39, %v5437_v39 }
 0x13e   : > { %4275 = vmatprep.mubr.f32.mxu1 %v5431_v35 }
 0x13f   : > { %v4180_v45 = vpop.f32.mrb[8].mxu0  ;;  %4401 = vmatmul.mubr.f32.gmra.mrb[36].mxu0 %v1299_v43  ;;  %v4212_v46 = vpop.f32.mrb[8].mxu1 }
 0x140   : > { %v666_v47 = vpop.f32.mrb[9].mxu0  ;;  %4403 = vmatprep.mubr.f32.mxu0 %v1300_v44  ;;  %v5455_v48 = vadd.f32 %v4212_v46, %v5378_v3  ;;  %v794_v49 = vpop.f32.mrb[9].mxu1  ;;  %v5467_v55 = vadd.f32 %v4180_v45, %v5378_v3 }
 0x141   : > { %v5458_v50 = vadd.f32 %v5378_v3, %v666_v47  ;;  %v4181_v51 = vpop.f32.mrb[10].mxu0  ;;  %4276 = vmatmul.mubr.f32.gmra.mrb[38].mxu1 %v5446_v42  ;;  %v5464_v53 = vadd.f32 %v5378_v3, %v794_v49  ;;  %v4213_v54 = vpop.f32.mrb[10].mxu1 }
 0x142   : > { %6488 = vst [vmem:[#allocation8_spill] sm:$0xff] %v5455_v48  ;;  %v669_v56 = vpop.f32.mrb[11].mxu0  ;;  %v5470_v57 = vadd.f32 %v4213_v54, %v5378_v3  ;;  %v797_v58 = vpop.f32.mrb[11].mxu1  ;;  %v5482_v62 = vadd.f32 %v4181_v51, %v5378_v3  ;;  %v1304_v0 = vmul.f32 %v5467_v55, %v5467_v55 }
 0x143   : > { %v5473_v59 = vadd.f32 %v5378_v3, %v669_v56  ;;  %4278 = vmatprep.mubr.f32.mxu1 %v5458_v50  ;;  %4404 = vmatmul.mubr.f32.gmra.mrb[38].mxu0 %v1301_v52  ;;  %v1302_v60 = vmul.f32 %v5458_v50, %v5458_v50  ;;  %v5479_v61 = vadd.f32 %v5378_v3, %v797_v58 }
 0x144   : > { %v1305_v13 = vmul.f32 %v5482_v62, %v5482_v62 }
 0x145   : > { %4279 = vmatmul.mubr.f32.gmra.mrb[40].mxu1 %v5473_v59  ;;  %4406 = vmatprep.mubr.f32.mxu0 %v1302_v60  ;;  %v1303_v63 = vmul.f32 %v5473_v59, %v5473_v59 }
 0x146   : > { %4281 = vmatprep.mubr.f32.mxu1 %v5467_v55 }
 0x147   : > { %v4184_v1 = vpop.f32.mrb[12].mxu0  ;;  %4407 = vmatmul.mubr.f32.gmra.mrb[40].mxu0 %v1303_v63  ;;  %v4216_v2 = vpop.f32.mrb[12].mxu1 }
 0x148   : > { %v682_v4 = vpop.f32.mrb[13].mxu0  ;;  %4409 = vmatprep.mubr.f32.mxu0 %v1304_v0  ;;  %v5491_v5 = vadd.f32 %v4216_v2, %v5378_v3  ;;  %v810_v6 = vpop.f32.mrb[13].mxu1  ;;  %v5503_v19 = vadd.f32 %v4184_v1, %v5378_v3 }
 0x149   : > { %v5494_v10 = vadd.f32 %v5378_v3, %v682_v4  ;;  %v4185_v11 = vpop.f32.mrb[14].mxu0  ;;  %4282 = vmatmul.mubr.f32.gmra.mrb[42].mxu1 %v5482_v62  ;;  %v5500_v15 = vadd.f32 %v5378_v3, %v810_v6  ;;  %v4217_v17 = vpop.f32.mrb[14].mxu1 }
 0x14a   : > { %6489 = vst [vmem:[#allocation9_spill] sm:$0xff] %v5491_v5  ;;  %v685_v20 = vpop.f32.mrb[15].mxu0  ;;  %v5506_v21 = vadd.f32 %v4217_v17, %v5378_v3  ;;  %v813_v23 = vpop.f32.mrb[15].mxu1  ;;  %v5518_v27 = vadd.f32 %v4185_v11, %v5378_v3  ;;  %v1308_v31 = vmul.f32 %v5503_v19, %v5503_v19 }
 0x14b   : > { %6490 = vst [vmem:[#allocation10_spill] sm:$0xff] %v5500_v15  ;;  %v5509_v24 = vadd.f32 %v5378_v3, %v685_v20  ;;  %4284 = vmatprep.mubr.f32.mxu1 %v5494_v10  ;;  %4410 = vmatmul.mubr.f32.gmra.mrb[42].mxu0 %v1305_v13  ;;  %v1306_v25 = vmul.f32 %v5494_v10, %v5494_v10 }
 0x14c   : > { %6491 = vst [vmem:[#allocation11_spill] sm:$0xff] %v5506_v21  ;;  %v5515_v26 = vadd.f32 %v5378_v3, %v813_v23  ;;  %v1309_v45 = vmul.f32 %v5518_v27, %v5518_v27 }
 0x14d   : > { %4285 = vmatmul.mubr.f32.gmra.mrb[44].mxu1 %v5509_v24  ;;  %4412 = vmatprep.mubr.f32.mxu0 %v1306_v25  ;;  %v1307_v29 = vmul.f32 %v5509_v24, %v5509_v24 }
 0x14e   : > { %6492 = vst [vmem:[#allocation12_spill] sm:$0xff] %v5515_v26  ;;  %4287 = vmatprep.mubr.f32.mxu1 %v5503_v19 }
 0x14f   : > { %v4188_v32 = vpop.f32.mrb[16].mxu0  ;;  %4413 = vmatmul.mubr.f32.gmra.mrb[44].mxu0 %v1307_v29  ;;  %v4220_v34 = vpop.f32.mrb[16].mxu1 }
 0x150   : > { %v698_v36 = vpop.f32.mrb[17].mxu0  ;;  %4415 = vmatprep.mubr.f32.mxu0 %v1308_v31  ;;  %v5527_v38 = vadd.f32 %v4220_v34, %v5378_v3  ;;  %v826_v40 = vpop.f32.mrb[17].mxu1  ;;  %v5539_v49 = vadd.f32 %v4188_v32, %v5378_v3 }
 0x151   : > { %v5530_v43 = vadd.f32 %v5378_v3, %v698_v36  ;;  %v4189_v44 = vpop.f32.mrb[18].mxu0  ;;  %4288 = vmatmul.mubr.f32.gmra.mrb[46].mxu1 %v5518_v27  ;;  %v5536_v46 = vadd.f32 %v5378_v3, %v826_v40  ;;  %v4221_v47 = vpop.f32.mrb[18].mxu1 }
 0x152   : > { %6493 = vst [vmem:[#allocation13_spill] sm:$0xff] %v5527_v38  ;;  %v701_v51 = vpop.f32.mrb[19].mxu0  ;;  %v5542_v52 = vadd.f32 %v4221_v47, %v5378_v3  ;;  %v829_v54 = vpop.f32.mrb[19].mxu1  ;;  %v5554_v63 = vadd.f32 %v4189_v44, %v5378_v3  ;;  %v1312_v1 = vmul.f32 %v5539_v49, %v5539_v49 }
 0x153   : > { %6494 = vst [vmem:[#allocation14_spill] sm:$0xff] %v5536_v46  ;;  %v5545_v56 = vadd.f32 %v5378_v3, %v701_v51  ;;  %4290 = vmatprep.mubr.f32.mxu1 %v5530_v43  ;;  %4416 = vmatmul.mubr.f32.gmra.mrb[46].mxu0 %v1309_v45  ;;  %v1310_v58 = vmul.f32 %v5530_v43, %v5530_v43 }
 0x154   : > { %6495 = vst [vmem:[#allocation15_spill] sm:$0xff] %v5542_v52  ;;  %v5551_v60 = vadd.f32 %v5378_v3, %v829_v54  ;;  %v1313_v23 = vmul.f32 %v5554_v63, %v5554_v63 }
 0x155   : > { %4291 = vmatmul.mubr.f32.gmra.mrb[48].mxu1 %v5545_v56  ;;  %4418 = vmatprep.mubr.f32.mxu0 %v1310_v58  ;;  %v1311_v0 = vmul.f32 %v5545_v56, %v5545_v56 }
 0x156   : > { %6496 = vst [vmem:[#allocation16_spill] sm:$0xff] %v5551_v60  ;;  %4293 = vmatprep.mubr.f32.mxu1 %v5539_v49 }
 0x157   : > { %v4192_v2 = vpop.f32.mrb[20].mxu0  ;;  %4419 = vmatmul.mubr.f32.gmra.mrb[48].mxu0 %v1311_v0  ;;  %v4224_v4 = vpop.f32.mrb[20].mxu1 }
 0x158   : > { %v714_v6 = vpop.f32.mrb[21].mxu0  ;;  %4421 = vmatprep.mubr.f32.mxu0 %v1312_v1  ;;  %v5563_v11 = vadd.f32 %v4224_v4, %v5378_v3  ;;  %v842_v13 = vpop.f32.mrb[21].mxu1  ;;  %v5575_v31 = vadd.f32 %v4192_v2, %v5378_v3 }
 0x159   : > { %v5566_v17 = vadd.f32 %v5378_v3, %v714_v6  ;;  %v4193_v20 = vpop.f32.mrb[22].mxu0  ;;  %4294 = vmatmul.mubr.f32.gmra.mrb[50].mxu1 %v5554_v63  ;;  %v5572_v25 = vadd.f32 %v5378_v3, %v842_v13  ;;  %v4225_v29 = vpop.f32.mrb[22].mxu1 }
 0x15a   : > { %6497 = vst [vmem:[#allocation17_spill] sm:$0xff] %v5563_v11  ;;  %6500 = vst [vmem:[#allocation20_spill] sm:$0xff] %v5575_v31  ;;  %v717_v32 = vpop.f32.mrb[23].mxu0  ;;  %v5578_v34 = vadd.f32 %v4225_v29, %v5378_v3  ;;  %v845_v36 = vpop.f32.mrb[23].mxu1  ;;  %v5590_v47 = vadd.f32 %v4193_v20, %v5378_v3  ;;  %v1316_v54 = vmul.f32 %v5575_v31, %v5575_v31 }
 0x15b   : > { %6498 = vst [vmem:[#allocation18_spill] sm:$0xff] %v5566_v17  ;;  %6499 = vst [vmem:[#allocation19_spill] sm:$0xff] %v5572_v25  ;;  %v5581_v40 = vadd.f32 %v5378_v3, %v717_v32  ;;  %4296 = vmatprep.mubr.f32.mxu1 %v5566_v17  ;;  %4422 = vmatmul.mubr.f32.gmra.mrb[50].mxu0 %v1313_v23  ;;  %v1314_v44 = vmul.f32 %v5566_v17, %v5566_v17 }
 0x15c   : > { %6501 = vst [vmem:[#allocation21_spill] sm:$0xff] %v5578_v34  ;;  %v5587_v45 = vadd.f32 %v5378_v3, %v845_v36  ;;  %6503 = vst [vmem:[#allocation23_spill] sm:$0xff] %v5590_v47  ;;  %v1317_v20 = vmul.f32 %v5590_v47, %v5590_v47 }
 0x15d   : > { %4297 = vmatmul.mubr.f32.gmra.mrb[52].mxu1 %v5581_v40  ;;  %4424 = vmatprep.mubr.f32.mxu0 %v1314_v44  ;;  %v1315_v51 = vmul.f32 %v5581_v40, %v5581_v40 }
 0x15e   : > { %6502 = vst [vmem:[#allocation22_spill] sm:$0xff] %v5587_v45  ;;  %4299 = vmatprep.mubr.f32.mxu1 %v5575_v31 }
 0x15f   : > { %v4196_v58 = vpop.f32.mrb[24].mxu0  ;;  %4425 = vmatmul.mubr.f32.gmra.mrb[52].mxu0 %v1315_v51  ;;  %v4228_v0 = vpop.f32.mrb[24].mxu1 }
 0x160   : > { %v730_v1 = vpop.f32.mrb[25].mxu0  ;;  %4427 = vmatprep.mubr.f32.mxu0 %v1316_v54  ;;  %v5599_v2 = vadd.f32 %v4228_v0, %v5378_v3  ;;  %v858_v4 = vpop.f32.mrb[25].mxu1  ;;  %v5611_v32 = vadd.f32 %v4196_v58, %v5378_v3 }
 0x161   : > { %v5602_v6 = vadd.f32 %v5378_v3, %v730_v1  ;;  %v4197_v13 = vpop.f32.mrb[26].mxu0  ;;  %4300 = vmatmul.mubr.f32.gmra.mrb[54].mxu1 %v5590_v47  ;;  %v5608_v23 = vadd.f32 %v5378_v3, %v858_v4  ;;  %v4229_v29 = vpop.f32.mrb[26].mxu1 }
 0x162   : > { %6504 = vst [vmem:[#allocation24_spill] sm:$0xff] %v5599_v2  ;;  %6507 = vst [vmem:[#allocation27_spill] sm:$0xff] %v5611_v32  ;;  %v733_v36 = vpop.f32.mrb[27].mxu0  ;;  %v5614_v44 = vadd.f32 %v4229_v29, %v5378_v3  ;;  %v861_v51 = vpop.f32.mrb[27].mxu1  ;;  %v5626_v58 = vadd.f32 %v4197_v13, %v5378_v3 }
 0x163   : > { %6505 = vst [vmem:[#allocation25_spill] sm:$0xff] %v5602_v6  ;;  %6506 = vst [vmem:[#allocation26_spill] sm:$0xff] %v5608_v23  ;;  %v5617_v54 = vadd.f32 %v5378_v3, %v733_v36  ;;  %4302 = vmatprep.mubr.f32.mxu1 %v5602_v6  ;;  %4428 = vmatmul.mubr.f32.gmra.mrb[54].mxu0 %v1317_v20  ;;  %v1318_v0 = vmul.f32 %v5602_v6, %v5602_v6 }
 0x164   : > { %6508 = vst [vmem:[#allocation28_spill] sm:$0xff] %v5614_v44  ;;  %v5623_v1 = vadd.f32 %v5378_v3, %v861_v51  ;;  %6511 = vst [vmem:[#allocation31_spill] sm:$0xff] %v5626_v58  ;;  %v1320_v20 = vmul.f32 %v5611_v32, %v5611_v32 }
 0x165   : > { %6509 = vst [vmem:[#allocation29_spill] sm:$0xff] %v5617_v54  ;;  %4303 = vmatmul.mubr.f32.gmra.mrb[56].mxu1 %v5617_v54  ;;  %4430 = vmatprep.mubr.f32.mxu0 %v1318_v0  ;;  %v1319_v4 = vmul.f32 %v5617_v54, %v5617_v54  ;;  %v1321_v54 = vmul.f32 %v5626_v58, %v5626_v58 }
 0x166   : > { %6510 = vst [vmem:[#allocation30_spill] sm:$0xff] %v5623_v1  ;;  %4305 = vmatprep.mubr.f32.mxu1 %v5611_v32 }
 0x167   : > { %v4200_v29 = vpop.f32.mrb[28].mxu0  ;;  %4431 = vmatmul.mubr.f32.gmra.mrb[56].mxu0 %v1319_v4  ;;  %v4232_v36 = vpop.f32.mrb[28].mxu1 }
 0x168   : > { %v746_v6 = vpop.f32.mrb[29].mxu0  ;;  %4433 = vmatprep.mubr.f32.mxu0 %v1320_v20  ;;  %v5635_v51 = vadd.f32 %v4232_v36, %v5378_v3  ;;  %v874_v13 = vpop.f32.mrb[29].mxu1  ;;  %v5647_v47 = vadd.f32 %v4200_v29, %v5378_v3  ;;  %v5663_v29 = vadd.f32 %v5378_v3, %v5383_v8 }
 0x169   : > { %v5638_v31 = vadd.f32 %v5378_v3, %v746_v6  ;;  %v4201_v0 = vpop.f32.mrb[30].mxu0  ;;  %4306 = vmatmul.mubr.f32.gmra.mrb[58].mxu1 %v5626_v58  ;;  %v5644_v32 = vadd.f32 %v5378_v3, %v874_v13  ;;  %v4233_v4 = vpop.f32.mrb[30].mxu1 }
 0x16a   : > { %6512 = vst [vmem:[#allocation32_spill] sm:$0xff] %v5635_v51  ;;  %v749_v20 = vpop.f32.mrb[31].mxu0  ;;  %v5650_v36 = vadd.f32 %v4233_v4, %v5378_v3  ;;  %v877_v17 = vpop.f32.mrb[31].mxu1  ;;  %v5666_v4 = vadd.f32 %v4201_v0, %v5378_v3  ;;  %v1326_v8 = vmul.f32 %v5663_v29, %v5663_v29  ;;  %v1330_v0 = vmul.f32 %v5428_v33, %v5428_v33 }
 0x16b   : > { %6513 = vst [vmem:[#allocation33_spill] sm:$0xff] %v5644_v32  ;;  %v5653_v6 = vadd.f32 %v5378_v3, %v749_v20  ;;  %4308 = vmatprep.mubr.f32.mxu1 %v5638_v31  ;;  %4434 = vmatmul.mubr.f32.gmra.mrb[58].mxu0 %v1321_v54  ;;  %v1322_v58 = vmul.f32 %v5638_v31, %v5638_v31 }
 0x16c   : > { %6514 = vst [vmem:[#allocation34_spill] sm:$0xff] %v5650_v36  ;;  %v5659_v13 = vadd.f32 %v5378_v3, %v877_v17  ;;  %v1324_v54 = vmul.f32 %v5647_v47, %v5647_v47  ;;  %v1325_v3 = vmul.f32 %v5666_v4, %v5666_v4  ;;  %v1327_v17 = vmul.f32 %v5401_v18, %v5401_v18 }
 0x16d   : > { %4309 = vmatmul.mubr.f32.gmra.mrb[60].mxu1 %v5653_v6  ;;  %4436 = vmatprep.mubr.f32.mxu0 %v1322_v58  ;;  %v1323_v20 = vmul.f32 %v5653_v6, %v5653_v6  ;;  %v1328_v58 = vmul.f32 %v5381_v7, %v5381_v7 }
 0x16e   : > { %6515 = vst [vmem:[#allocation35_spill] sm:$0xff] %v5659_v13  ;;  %4311 = vmatprep.mubr.f32.mxu1 %v5647_v47 }
 0x16f   : > { %4437 = vmatmul.mubr.f32.gmra.mrb[60].mxu0 %v1323_v20  ;;  %v1329_v20 = vmul.f32 %v5392_v14, %v5392_v14 }
 0x170   : > { %4439 = vmatprep.mubr.f32.mxu0 %v1324_v54  ;;  %v1331_v54 = vmul.f32 %v5443_v41, %v5443_v41 }
 0x171   : > { %4312 = vmatmul.mubr.f32.gmra.mrb[62].mxu1 %v5666_v4 }
 0x172   : > { %4314 = vmatprep.mubr.f32.mxu1 %v5663_v29 }
 0x173   : > { %4440 = vmatmul.mubr.f32.gmra.mrb[62].mxu0 %v1325_v3  ;;  %v1334_v3 = vmul.f32 %v5464_v53, %v5464_v53 }
 0x174   : > { %4442 = vmatprep.mubr.f32.mxu0 %v1326_v8  ;;  %v1332_v8 = vmul.f32 %v5419_v28, %v5419_v28 }
 0x175   : > { %4315 = vmatmul.mubr.f32.gmra.mrb[64].mxu1 %v5401_v18 }
 0x176   : > { %4317 = vmatprep.mubr.f32.mxu1 %v5381_v7 }
 0x177   : > { %4443 = vmatmul.mubr.f32.gmra.mrb[64].mxu0 %v1327_v17  ;;  %v1333_v17 = vmul.f32 %v5434_v37, %v5434_v37 }
 0x178   : > { %4445 = vmatprep.mubr.f32.mxu0 %v1328_v58  ;;  %v1335_v58 = vmul.f32 %v5479_v61, %v5479_v61 }
 0x179   : > { %4318 = vmatmul.mubr.f32.gmra.mrb[66].mxu1 %v5392_v14 }
 0x17a   : > { %4320 = vmatprep.mubr.f32.mxu1 %v5428_v33 }
 0x17b   : > { %4446 = vmatmul.mubr.f32.gmra.mrb[66].mxu0 %v1329_v20  ;;  %v1338_v20 = vmul.f32 %v5500_v15, %v5500_v15 }
 0x17c   : > { %4448 = vmatprep.mubr.f32.mxu0 %v1330_v0  ;;  %v1336_v0 = vmul.f32 %v5455_v48, %v5455_v48 }
 0x17d   : > { %4321 = vmatmul.mubr.f32.gmra.mrb[68].mxu1 %v5443_v41 }
 0x17e   : > { %4323 = vmatprep.mubr.f32.mxu1 %v5419_v28 }
 0x17f   : > { %4449 = vmatmul.mubr.f32.gmra.mrb[68].mxu0 %v1331_v54  ;;  %v1337_v54 = vmul.f32 %v5470_v57, %v5470_v57 }
 0x180   : > { %4451 = vmatprep.mubr.f32.mxu0 %v1332_v8  ;;  %v1339_v8 = vmul.f32 %v5515_v26, %v5515_v26 }
 0x181   : > { %4324 = vmatmul.mubr.f32.gmra.mrb[70].mxu1 %v5434_v37 }
 0x182   : > { %4326 = vmatprep.mubr.f32.mxu1 %v5464_v53 }
 0x183   : > { %4452 = vmatmul.mubr.f32.gmra.mrb[70].mxu0 %v1333_v17  ;;  %v1342_v17 = vmul.f32 %v5536_v46, %v5536_v46 }
 0x184   : > { %4454 = vmatprep.mubr.f32.mxu0 %v1334_v3  ;;  %v1340_v3 = vmul.f32 %v5491_v5, %v5491_v5 }
 0x185   : > { %4327 = vmatmul.mubr.f32.gmra.mrb[72].mxu1 %v5479_v61 }
 0x186   : > { %4329 = vmatprep.mubr.f32.mxu1 %v5455_v48 }
 0x187   : > { %4455 = vmatmul.mubr.f32.gmra.mrb[72].mxu0 %v1335_v58  ;;  %v1341_v58 = vmul.f32 %v5506_v21, %v5506_v21 }
 0x188   : > { %4457 = vmatprep.mubr.f32.mxu0 %v1336_v0  ;;  %v1343_v0 = vmul.f32 %v5551_v60, %v5551_v60 }
 0x189   : > { %4330 = vmatmul.mubr.f32.gmra.mrb[74].mxu1 %v5470_v57 }
 0x18a   : > { %4332 = vmatprep.mubr.f32.mxu1 %v5500_v15 }
 0x18b   : > { %4458 = vmatmul.mubr.f32.gmra.mrb[74].mxu0 %v1337_v54  ;;  %v1346_v54 = vmul.f32 %v5572_v25, %v5572_v25 }
 0x18c   : > { %4460 = vmatprep.mubr.f32.mxu0 %v1338_v20  ;;  %v1344_v20 = vmul.f32 %v5527_v38, %v5527_v38 }
 0x18d   : > { %4333 = vmatmul.mubr.f32.gmra.mrb[76].mxu1 %v5515_v26 }
 0x18e   : > { %4335 = vmatprep.mubr.f32.mxu1 %v5491_v5 }
 0x18f   : > { %4461 = vmatmul.mubr.f32.gmra.mrb[76].mxu0 %v1339_v8  ;;  %v1345_v8 = vmul.f32 %v5542_v52, %v5542_v52 }
 0x190   : > { %4463 = vmatprep.mubr.f32.mxu0 %v1340_v3  ;;  %v1347_v3 = vmul.f32 %v5587_v45, %v5587_v45 }
 0x191   : > { %4336 = vmatmul.mubr.f32.gmra.mrb[78].mxu1 %v5506_v21 }
 0x192   : > { %4338 = vmatprep.mubr.f32.mxu1 %v5536_v46 }
 0x193   : > { %4464 = vmatmul.mubr.f32.gmra.mrb[78].mxu0 %v1341_v58  ;;  %v1350_v58 = vmul.f32 %v5608_v23, %v5608_v23 }
 0x194   : > { %4466 = vmatprep.mubr.f32.mxu0 %v1342_v17  ;;  %v1348_v17 = vmul.f32 %v5563_v11, %v5563_v11 }
 0x195   : > { %4339 = vmatmul.mubr.f32.gmra.mrb[80].mxu1 %v5551_v60 }
 0x196   : > { %4341 = vmatprep.mubr.f32.mxu1 %v5527_v38 }
 0x197   : > { %4467 = vmatmul.mubr.f32.gmra.mrb[80].mxu0 %v1343_v0  ;;  %v1349_v0 = vmul.f32 %v5578_v34, %v5578_v34 }
 0x198   : > { %4469 = vmatprep.mubr.f32.mxu0 %v1344_v20  ;;  %v1351_v20 = vmul.f32 %v5623_v1, %v5623_v1 }
 0x199   : > { %4342 = vmatmul.mubr.f32.gmra.mrb[82].mxu1 %v5542_v52 }
 0x19a   : > { %4344 = vmatprep.mubr.f32.mxu1 %v5572_v25 }
 0x19b   : > { %4470 = vmatmul.mubr.f32.gmra.mrb[82].mxu0 %v1345_v8  ;;  %v1354_v8 = vmul.f32 %v5644_v32, %v5644_v32 }
 0x19c   : > { %4472 = vmatprep.mubr.f32.mxu0 %v1346_v54  ;;  %v1352_v54 = vmul.f32 %v5599_v2, %v5599_v2 }
 0x19d   : > { %4345 = vmatmul.mubr.f32.gmra.mrb[84].mxu1 %v5587_v45 }
 0x19e   : > { %4347 = vmatprep.mubr.f32.mxu1 %v5563_v11 }
 0x19f   : > { %4473 = vmatmul.mubr.f32.gmra.mrb[84].mxu0 %v1347_v3  ;;  %v1353_v3 = vmul.f32 %v5614_v44, %v5614_v44 }
 0x1a0   : > { %4475 = vmatprep.mubr.f32.mxu0 %v1348_v17  ;;  %v1355_v17 = vmul.f32 %v5659_v13, %v5659_v13 }
 0x1a1   : > { %4348 = vmatmul.mubr.f32.gmra.mrb[86].mxu1 %v5578_v34 }
 0x1a2   : > { %4350 = vmatprep.mubr.f32.mxu1 %v5608_v23 }
 0x1a3   : > { %4476 = vmatmul.mubr.f32.gmra.mrb[86].mxu0 %v1349_v0  ;;  %v1357_v0 = vmul.f32 %v5650_v36, %v5650_v36 }
 0x1a4   : > { %4478 = vmatprep.mubr.f32.mxu0 %v1350_v58  ;;  %v1356_v58 = vmul.f32 %v5635_v51, %v5635_v51 }
 0x1a5   : > { %4351 = vmatmul.mubr.f32.gmra.mrb[88].mxu1 %v5623_v1 }
 0x1a6   : > { %4353 = vmatprep.mubr.f32.mxu1 %v5599_v2 }
 0x1a7   : > { %4479 = vmatmul.mubr.f32.gmra.mrb[88].mxu0 %v1351_v20 }
 0x1a8   : > { %4481 = vmatprep.mubr.f32.mxu0 %v1352_v54 }
 0x1a9   : > { %4354 = vmatmul.mubr.f32.gmra.mrb[90].mxu1 %v5614_v44 }
 0x1aa   : > { %4356 = vmatprep.mubr.f32.mxu1 %v5644_v32 }
 0x1ab   : > { %4482 = vmatmul.mubr.f32.gmra.mrb[90].mxu0 %v1353_v3 }
 0x1ac   : > { %4484 = vmatprep.mubr.f32.mxu0 %v1354_v8 }
 0x1ad   : > { %4357 = vmatmul.mubr.f32.gmra.mrb[92].mxu1 %v5659_v13 }
 0x1ae   : > { %4359 = vmatprep.mubr.f32.mxu1 %v5635_v51 }
 0x1af   : > { %4485 = vmatmul.mubr.f32.gmra.mrb[92].mxu0 %v1355_v17 }
 0x1b0   : > { %4487 = vmatprep.mubr.f32.mxu0 %v1356_v58 }
 0x1b1   : > { %4360 = vmatmul.mubr.f32.gmra.mrb[94].mxu1 %v5650_v36 }
 0x1b3   : > { %4488 = vmatmul.mubr.f32.gmra.mrb[94].mxu0 %v1357_v0 }
 0x208   : > { %v4268_v20 = vpop.f32.mrb[32].mxu1 }
 0x209   : > { %v1744_v54 = vmul.f32 %v4268_v20, %v4268_v20  ;;  %v975_v8 = vpop.f32.mrb[33].mxu1 }
 0x20a   : > { %v1743_v3 = vmul.f32 %v975_v8, %v975_v8  ;;  %v4396_v32 = vpop.f32.mrb[32].mxu0 }
 0x20b   : > { %v1808_v2 = vsub.f32 %v4396_v32, %v1744_v54  ;;  %v1424_v13 = vpop.f32.mrb[33].mxu0 }
 0x20c   : > { %v1807_v44 = vsub.f32 %v1424_v13, %v1743_v3  ;;  %v5773_v23 = vpop.f32.mrb[34].mxu1 }
 0x20d   : > { %v1872_v1 = vadd.f32 1e-05, %v1808_v2  ;;  %v1746_v17 = vmul.f32 %v5773_v23, %v5773_v23  ;;  %v5777_v58 = vpop.f32.mrb[35].mxu1 }
 0x20e   : > { %v1871_v51 = vadd.f32 1e-05, %v1807_v44  ;;  %v1745_v0 = vmul.f32 %v5777_v58, %v5777_v58  ;;  %v4399_v36 = vpop.f32.mrb[34].mxu0 }
 0x20f   : > { %4884 = vrsqrt.f32 %v1872_v1  ;;  %v1810_v11 = vsub.f32 %v4399_v36, %v1746_v17  ;;  %v1434_v34 = vpop.f32.mrb[35].mxu0 }
 0x210   : > { %4886 = vrsqrt.f32 %v1871_v51  ;;  %v1809_v32 = vsub.f32 %v1434_v34, %v1745_v0  ;;  %v5781_v54 = vpop.f32.mrb[36].mxu1 }
 0x211   : > { %v1874_v13 = vadd.f32 1e-05, %v1810_v11  ;;  %v1748_v2 = vmul.f32 %v5781_v54, %v5781_v54  ;;  %v5785_v3 = vpop.f32.mrb[37].mxu1 }
 0x212   : > { %v1873_v25 = vadd.f32 1e-05, %v1809_v32  ;;  %v1747_v44 = vmul.f32 %v5785_v3, %v5785_v3  ;;  %v4402_v45 = vpop.f32.mrb[36].mxu0 }
 0x213   : > { %4888 = vrsqrt.f32 %v1874_v13  ;;  %v1812_v38 = vsub.f32 %v4402_v45, %v1748_v2  ;;  %v1444_v1 = vpop.f32.mrb[37].mxu0 }
 0x214   : > { %4890 = vrsqrt.f32 %v1873_v25  ;;  %v1811_v36 = vsub.f32 %v1444_v1, %v1747_v44  ;;  %v5789_v51 = vpop.f32.mrb[38].mxu1 }
 0x215   : > { %v1876_v34 = vadd.f32 1e-05, %v1812_v38  ;;  %v1750_v11 = vmul.f32 %v5789_v51, %v5789_v51  ;;  %v5793_v17 = vpop.f32.mrb[39].mxu1 }
 0x216   : > { %v1875_v0 = vadd.f32 1e-05, %v1811_v36  ;;  %v1749_v32 = vmul.f32 %v5793_v17, %v5793_v17  ;;  %v4405_v52 = vpop.f32.mrb[38].mxu0 }
 0x217   : > { %4892 = vrsqrt.f32 %v1876_v34  ;;  %v1814_v46 = vsub.f32 %v4405_v52, %v1750_v11  ;;  %v1454_v13 = vpop.f32.mrb[39].mxu0 }
 0x218   : > { %4894 = vrsqrt.f32 %v1875_v0  ;;  %v1813_v45 = vsub.f32 %v1454_v13, %v1749_v32  ;;  %v5797_v25 = vpop.f32.mrb[40].mxu1 }
 0x219   : > { %v4885_v2 = vpop.eup %4884  ;;  %v1878_v38 = vadd.f32 1e-05, %v1814_v46  ;;  %v1752_v44 = vmul.f32 %v5797_v25, %v5797_v25  ;;  %v5801_v1 = vpop.f32.mrb[41].mxu1 }
 0x21a   : > { %v4887_v36 = vpop.eup %4886  ;;  %v2578_v60 = vmul.f32 %v4885_v2, %v4268_v20  ;;  %v1877_v5 = vadd.f32 1e-05, %v1813_v45  ;;  %v1751_v34 = vmul.f32 %v5801_v1, %v5801_v1  ;;  %v4408_v52 = vpop.f32.mrb[40].mxu0 }
 0x21b   : > { %4896 = vrsqrt.f32 %v1878_v38  ;;  %v1816_v11 = vsub.f32 %v4408_v52, %v1752_v44  ;;  %v1464_v0 = vpop.f32.mrb[41].mxu0  ;;  %4498 = vmatprep.mubr.msk.f32.mxu1 %vm1999_vm0, %v4887_v36  ;;  %v2577_v32 = vmul.f32 %v4887_v36, %v975_v8 }
 0x21c   : > { %4898 = vrsqrt.f32 %v1877_v5  ;;  %v1815_v46 = vsub.f32 %v1464_v0, %v1751_v34  ;;  %v5806_v13 = vpop.f32.mrb[42].mxu1  ;;  %4499 = vmatmul.mubr.msk.f32.vlgmr.msra.gmra.mrb[96].mxu1 %vm1999_vm0, %v4885_v2 }
 0x21d   : > { %v4889_v21 = vpop.eup %4888  ;;  %v1880_v15 = vadd.f32 1e-05, %v1816_v11  ;;  %v1754_v20 = vmul.f32 %v5806_v13, %v5806_v13  ;;  %v5811_v45 = vpop.f32.mrb[43].mxu1  ;;  %4602 = vmatprep.mubr.msk.f32.mxu0 %vm1999_vm0, %v2577_v32 }
 0x21e   : > { %v4891_v38 = vpop.eup %4890  ;;  %v1879_v44 = vadd.f32 1e-05, %v1815_v46  ;;  %v1753_v8 = vmul.f32 %v5811_v45, %v5811_v45  ;;  %v4411_v5 = vpop.f32.mrb[42].mxu0  ;;  %4603 = vmatmul.mubr.msk.f32.vlgmr.msra.gmra.mrb[96].mxu0 %vm1999_vm0, %v2578_v60  ;;  %v2580_v36 = vmul.f32 %v4889_v21, %v5773_v23 }
 0x21f   : > { %4900 = vrsqrt.f32 %v1880_v15  ;;  %v1818_v2 = vsub.f32 %v4411_v5, %v1754_v20  ;;  %v1474_v34 = vpop.f32.mrb[43].mxu0  ;;  %4501 = vmatprep.mubr.msk.f32.mxu1 %vm1999_vm0, %v4891_v38  ;;  %v2579_v52 = vmul.f32 %v4891_v38, %v5777_v58 }
 0x220   : > { %4902 = vrsqrt.f32 %v1879_v44  ;;  %v1817_v11 = vsub.f32 %v1474_v34, %v1753_v8  ;;  %v5820_v0 = vpop.f32.mrb[44].mxu1  ;;  %4502 = vmatmul.mubr.msk.f32.gmra.mrb[98].mxu1 %vm1999_vm0, %v4889_v21 }
 0x221   : > { %v4893_v32 = vpop.eup %4892  ;;  %v1882_v46 = vadd.f32 1e-05, %v1818_v2  ;;  %v1756_v60 = vmul.f32 %v5820_v0, %v5820_v0  ;;  %v5825_v26 = vpop.f32.mrb[45].mxu1  ;;  %4605 = vmatprep.mubr.msk.f32.mxu0 %vm1999_vm0, %v2579_v52 }
 0x222   : > { %v4895_v15 = vpop.eup %4894  ;;  %v1881_v23 = vadd.f32 1e-05, %v1817_v11  ;;  %v1755_v58 = vmul.f32 %v5825_v26, %v5825_v26  ;;  %v4414_v20 = vpop.f32.mrb[44].mxu0  ;;  %4606 = vmatmul.mubr.msk.f32.gmra.mrb[98].mxu0 %vm1999_vm0, %v2580_v36  ;;  %v2582_v38 = vmul.f32 %v4893_v32, %v5781_v54 }
 0x223   : > { %4904 = vrsqrt.f32 %v1882_v46  ;;  %v1820_v21 = vsub.f32 %v4414_v20, %v1756_v60  ;;  %v1484_v44 = vpop.f32.mrb[45].mxu0  ;;  %4504 = vmatprep.mubr.msk.f32.mxu1 %vm1999_vm0, %v4895_v15  ;;  %v2581_v8 = vmul.f32 %v4895_v15, %v5785_v3 }
 0x224   : > { %4906 = vrsqrt.f32 %v1881_v23  ;;  %v1819_v5 = vsub.f32 %v1484_v44, %v1755_v58  ;;  %v5834_v2 = vpop.f32.mrb[46].mxu1  ;;  %4505 = vmatmul.mubr.msk.f32.gmra.mrb[100].mxu1 %vm1999_vm0, %v4893_v32 }
 0x225   : > { %v4897_v34 = vpop.eup %4896  ;;  %v1884_v52 = vadd.f32 1e-05, %v1820_v21  ;;  %v1758_v36 = vmul.f32 %v5834_v2, %v5834_v2  ;;  %v5839_v11 = vpop.f32.mrb[47].mxu1  ;;  %4608 = vmatprep.mubr.msk.f32.mxu0 %vm1999_vm0, %v2581_v8 }
 0x226   : > { %v4899_v54 = vpop.eup %4898  ;;  %v1883_v46 = vadd.f32 1e-05, %v1819_v5  ;;  %v1757_v3 = vmul.f32 %v5839_v11, %v5839_v11  ;;  %v4417_v60 = vpop.f32.mrb[46].mxu0  ;;  %4609 = vmatmul.mubr.msk.f32.gmra.mrb[100].mxu0 %vm1999_vm0, %v2582_v38  ;;  %v2584_v15 = vmul.f32 %v4897_v34, %v5789_v51 }
 0x227   : > { %4908 = vrsqrt.f32 %v1884_v52  ;;  %v1822_v32 = vsub.f32 %v4417_v60, %v1758_v36  ;;  %v1494_v23 = vpop.f32.mrb[47].mxu0  ;;  %4507 = vmatprep.mubr.msk.f32.mxu1 %vm1999_vm0, %v4899_v54  ;;  %v2583_v58 = vmul.f32 %v4899_v54, %v5793_v17 }
 0x228   : > { %4910 = vrsqrt.f32 %v1883_v46  ;;  %v1821_v20 = vsub.f32 %v1494_v23, %v1757_v3  ;;  %v5848_v21 = vpop.f32.mrb[48].mxu1  ;;  %4508 = vmatmul.mubr.msk.f32.gmra.mrb[102].mxu1 %vm1999_vm0, %v4897_v34 }
 0x229   : > { %v4901_v44 = vpop.eup %4900  ;;  %v1886_v8 = vadd.f32 1e-05, %v1822_v32  ;;  %v1760_v38 = vmul.f32 %v5848_v21, %v5848_v21  ;;  %v5853_v5 = vpop.f32.mrb[49].mxu1  ;;  %4611 = vmatprep.mubr.msk.f32.mxu0 %vm1999_vm0, %v2583_v58 }
 0x22a   : > { %v4903_v51 = vpop.eup %4902  ;;  %v1885_v52 = vadd.f32 1e-05, %v1821_v20  ;;  %v1759_v17 = vmul.f32 %v5853_v5, %v5853_v5  ;;  %v4420_v36 = vpop.f32.mrb[48].mxu0  ;;  %4612 = vmatmul.mubr.msk.f32.gmra.mrb[102].mxu0 %vm1999_vm0, %v2584_v15  ;;  %v2586_v54 = vmul.f32 %v4901_v44, %v5797_v25 }
 0x22b   : > { %4912 = vrsqrt.f32 %v1886_v8  ;;  %v1824_v34 = vsub.f32 %v4420_v36, %v1760_v38  ;;  %v1504_v46 = vpop.f32.mrb[49].mxu0  ;;  %4510 = vmatprep.mubr.msk.f32.mxu1 %vm1999_vm0, %v4903_v51  ;;  %v2585_v3 = vmul.f32 %v4903_v51, %v5801_v1 }
 0x22c   : > { %4914 = vrsqrt.f32 %v1885_v52  ;;  %v1823_v60 = vsub.f32 %v1504_v46, %v1759_v17  ;;  %v5862_v32 = vpop.f32.mrb[50].mxu1  ;;  %4511 = vmatmul.mubr.msk.f32.gmra.mrb[104].mxu1 %vm1999_vm0, %v4901_v44 }
 0x22d   : > { %v4905_v23 = vpop.eup %4904  ;;  %v1888_v58 = vadd.f32 1e-05, %v1824_v34  ;;  %v1762_v15 = vmul.f32 %v5862_v32, %v5862_v32  ;;  %v5867_v20 = vpop.f32.mrb[51].mxu1  ;;  %4614 = vmatprep.mubr.msk.f32.mxu0 %vm1999_vm0, %v2585_v3 }
 0x22e   : > { %v4907_v25 = vpop.eup %4906  ;;  %v1887_v8 = vadd.f32 1e-05, %v1823_v60  ;;  %v1761_v1 = vmul.f32 %v5867_v20, %v5867_v20  ;;  %v4423_v38 = vpop.f32.mrb[50].mxu0  ;;  %4615 = vmatmul.mubr.msk.f32.gmra.mrb[104].mxu0 %vm1999_vm0, %v2586_v54  ;;  %v2588_v51 = vmul.f32 %v4905_v23, %v5806_v13 }
 0x22f   : > { %4916 = vrsqrt.f32 %v1888_v58  ;;  %v1826_v44 = vsub.f32 %v4423_v38, %v1762_v15  ;;  %v1514_v52 = vpop.f32.mrb[51].mxu0  ;;  %4513 = vmatprep.mubr.msk.f32.mxu1 %vm1999_vm0, %v4907_v25  ;;  %v2587_v17 = vmul.f32 %v4907_v25, %v5811_v45 }
 0x230   : > { %4918 = vrsqrt.f32 %v1887_v8  ;;  %v1825_v36 = vsub.f32 %v1514_v52, %v1761_v1  ;;  %v5876_v34 = vpop.f32.mrb[52].mxu1  ;;  %4514 = vmatmul.mubr.msk.f32.gmra.mrb[106].mxu1 %vm1999_vm0, %v4905_v23 }
 0x231   : > { %v4909_v46 = vpop.eup %4908  ;;  %v1890_v3 = vadd.f32 1e-05, %v1826_v44  ;;  %v1764_v54 = vmul.f32 %v5876_v34, %v5876_v34  ;;  %v5881_v60 = vpop.f32.mrb[53].mxu1  ;;  %4617 = vmatprep.mubr.msk.f32.mxu0 %vm1999_vm0, %v2587_v17 }
 0x232   : > { %v4911_v13 = vpop.eup %4910  ;;  %v1889_v58 = vadd.f32 1e-05, %v1825_v36  ;;  %v1763_v45 = vmul.f32 %v5881_v60, %v5881_v60  ;;  %v4426_v15 = vpop.f32.mrb[52].mxu0  ;;  %4618 = vmatmul.mubr.msk.f32.gmra.mrb[106].mxu0 %vm1999_vm0, %v2588_v51  ;;  %v2590_v25 = vmul.f32 %v4909_v46, %v5820_v0 }
 0x233   : > { %4920 = vrsqrt.f32 %v1890_v3  ;;  %v1828_v23 = vsub.f32 %v4426_v15, %v1764_v54  ;;  %v1524_v8 = vpop.f32.mrb[53].mxu0  ;;  %4516 = vmatprep.mubr.msk.f32.mxu1 %vm1999_vm0, %v4911_v13  ;;  %v2589_v1 = vmul.f32 %v4911_v13, %v5825_v26 }
 0x234   : > { %4922 = vrsqrt.f32 %v1889_v58  ;;  %v1827_v38 = vsub.f32 %v1524_v8, %v1763_v45  ;;  %v5890_v44 = vpop.f32.mrb[54].mxu1  ;;  %4517 = vmatmul.mubr.msk.f32.gmra.mrb[108].mxu1 %vm1999_vm0, %v4909_v46 }
 0x235   : > { %v4913_v52 = vpop.eup %4912  ;;  %v1892_v17 = vadd.f32 1e-05, %v1828_v23  ;;  %v1766_v51 = vmul.f32 %v5890_v44, %v5890_v44  ;;  %v5895_v36 = vpop.f32.mrb[55].mxu1  ;;  %4620 = vmatprep.mubr.msk.f32.mxu0 %vm1999_vm0, %v2589_v1 }
 0x236   : > { %v4915_v0 = vpop.eup %4914  ;;  %v1891_v3 = vadd.f32 1e-05, %v1827_v38  ;;  %v1765_v26 = vmul.f32 %v5895_v36, %v5895_v36  ;;  %v4429_v54 = vpop.f32.mrb[54].mxu0  ;;  %4621 = vmatmul.mubr.msk.f32.gmra.mrb[108].mxu0 %vm1999_vm0, %v2590_v25  ;;  %v2592_v13 = vmul.f32 %v4913_v52, %v5834_v2 }
 0x237   : > { %4924 = vrsqrt.f32 %v1892_v17  ;;  %v1830_v46 = vsub.f32 %v4429_v54, %v1766_v51  ;;  %v1534_v58 = vpop.f32.mrb[55].mxu0  ;;  %4519 = vmatprep.mubr.msk.f32.mxu1 %vm1999_vm0, %v4915_v0  ;;  %v2591_v45 = vmul.f32 %v4915_v0, %v5839_v11 }
 0x238   : > { %4926 = vrsqrt.f32 %v1891_v3  ;;  %v1829_v15 = vsub.f32 %v1534_v58, %v1765_v26  ;;  %v5904_v23 = vpop.f32.mrb[56].mxu1  ;;  %4520 = vmatmul.mubr.msk.f32.gmra.mrb[110].mxu1 %vm1999_vm0, %v4913_v52 }
 0x239   : > { %v4917_v8 = vpop.eup %4916  ;;  %v1894_v1 = vadd.f32 1e-05, %v1830_v46  ;;  %v1768_v25 = vmul.f32 %v5904_v23, %v5904_v23  ;;  %v5909_v38 = vpop.f32.mrb[57].mxu1  ;;  %4623 = vmatprep.mubr.msk.f32.mxu0 %vm1999_vm0, %v2591_v45 }
 0x23a   : > { %v4919_v2 = vpop.eup %4918  ;;  %v1893_v17 = vadd.f32 1e-05, %v1829_v15  ;;  %v1767_v11 = vmul.f32 %v5909_v38, %v5909_v38  ;;  %v4432_v51 = vpop.f32.mrb[56].mxu0  ;;  %4624 = vmatmul.mubr.msk.f32.gmra.mrb[110].mxu0 %vm1999_vm0, %v2592_v13  ;;  %v2594_v0 = vmul.f32 %v4917_v8, %v5848_v21 }
 0x23b   : > { %4928 = vrsqrt.f32 %v1894_v1  ;;  %v1832_v52 = vsub.f32 %v4432_v51, %v1768_v25  ;;  %v1544_v3 = vpop.f32.mrb[57].mxu0  ;;  %4522 = vmatprep.mubr.msk.f32.mxu1 %vm1999_vm0, %v4919_v2  ;;  %v2593_v26 = vmul.f32 %v4919_v2, %v5853_v5 }
 0x23c   : > { %4930 = vrsqrt.f32 %v1893_v17  ;;  %v1831_v54 = vsub.f32 %v1544_v3, %v1767_v11  ;;  %v5918_v46 = vpop.f32.mrb[58].mxu1  ;;  %4523 = vmatmul.mubr.msk.f32.gmra.mrb[112].mxu1 %vm1999_vm0, %v4917_v8 }
 0x23d   : > { %v4921_v58 = vpop.eup %4920  ;;  %v1896_v45 = vadd.f32 1e-05, %v1832_v52  ;;  %v1770_v13 = vmul.f32 %v5918_v46, %v5918_v46  ;;  %v5923_v15 = vpop.f32.mrb[59].mxu1  ;;  %4626 = vmatprep.mubr.msk.f32.mxu0 %vm1999_vm0, %v2593_v26 }
 0x23e   : > { %v4923_v21 = vpop.eup %4922  ;;  %v1895_v1 = vadd.f32 1e-05, %v1831_v54  ;;  %v1769_v5 = vmul.f32 %v5923_v15, %v5923_v15  ;;  %v4435_v25 = vpop.f32.mrb[58].mxu0  ;;  %4627 = vmatmul.mubr.msk.f32.gmra.mrb[112].mxu0 %vm1999_vm0, %v2594_v0  ;;  %v2596_v2 = vmul.f32 %v4921_v58, %v5862_v32 }
 0x23f   : > { %4932 = vrsqrt.f32 %v1896_v45  ;;  %v1834_v8 = vsub.f32 %v4435_v25, %v1770_v13  ;;  %v1554_v17 = vpop.f32.mrb[59].mxu0  ;;  %4525 = vmatprep.mubr.msk.f32.mxu1 %vm1999_vm0, %v4923_v21  ;;  %v2595_v11 = vmul.f32 %v4923_v21, %v5867_v20 }
 0x240   : > { %4934 = vrsqrt.f32 %v1895_v1  ;;  %v1833_v51 = vsub.f32 %v1554_v17, %v1769_v5  ;;  %v5932_v52 = vpop.f32.mrb[60].mxu1  ;;  %4526 = vmatmul.mubr.msk.f32.gmra.mrb[114].mxu1 %vm1999_vm0, %v4921_v58 }
 0x241   : > { %v4925_v3 = vpop.eup %4924  ;;  %v1898_v26 = vadd.f32 1e-05, %v1834_v8  ;;  %v1772_v0 = vmul.f32 %v5932_v52, %v5932_v52  ;;  %v5937_v54 = vpop.f32.mrb[61].mxu1  ;;  %4629 = vmatprep.mubr.msk.f32.mxu0 %vm1999_vm0, %v2595_v11 }
 0x242   : > { %v4927_v32 = vpop.eup %4926  ;;  %v1897_v45 = vadd.f32 1e-05, %v1833_v51  ;;  %v1771_v20 = vmul.f32 %v5937_v54, %v5937_v54  ;;  %v4438_v13 = vpop.f32.mrb[60].mxu0  ;;  %4630 = vmatmul.mubr.msk.f32.gmra.mrb[114].mxu0 %vm1999_vm0, %v2596_v2  ;;  %v2598_v21 = vmul.f32 %v4925_v3, %v5876_v34 }
 0x243   : > { %4936 = vrsqrt.f32 %v1898_v26  ;;  %v1836_v58 = vsub.f32 %v4438_v13, %v1772_v0  ;;  %v1564_v1 = vpop.f32.mrb[61].mxu0  ;;  %4528 = vmatprep.mubr.msk.f32.mxu1 %vm1999_vm0, %v4927_v32  ;;  %v2597_v5 = vmul.f32 %v4927_v32, %v5881_v60 }
 0x244   : > { %4938 = vrsqrt.f32 %v1897_v45  ;;  %v1835_v25 = vsub.f32 %v1564_v1, %v1771_v20  ;;  %v5946_v8 = vpop.f32.mrb[62].mxu1  ;;  %4529 = vmatmul.mubr.msk.f32.gmra.mrb[116].mxu1 %vm1999_vm0, %v4925_v3 }
 0x245   : > { %v4929_v17 = vpop.eup %4928  ;;  %v1900_v11 = vadd.f32 1e-05, %v1836_v58  ;;  %v1774_v2 = vmul.f32 %v5946_v8, %v5946_v8  ;;  %v5951_v51 = vpop.f32.mrb[63].mxu1  ;;  %4632 = vmatprep.mubr.msk.f32.mxu0 %vm1999_vm0, %v2597_v5 }
 0x246   : > { %v4931_v34 = vpop.eup %4930  ;;  %v1899_v26 = vadd.f32 1e-05, %v1835_v25  ;;  %v1773_v60 = vmul.f32 %v5951_v51, %v5951_v51  ;;  %v4441_v0 = vpop.f32.mrb[62].mxu0  ;;  %4633 = vmatmul.mubr.msk.f32.gmra.mrb[116].mxu0 %vm1999_vm0, %v2598_v21  ;;  %v2600_v32 = vmul.f32 %v4929_v17, %v5890_v44 }
 0x247   : > { %4940 = vrsqrt.f32 %v1900_v11  ;;  %v1838_v3 = vsub.f32 %v4441_v0, %v1774_v2  ;;  %v1574_v45 = vpop.f32.mrb[63].mxu0  ;;  %4531 = vmatprep.mubr.msk.f32.mxu1 %vm1999_vm0, %v4931_v34  ;;  %v2599_v20 = vmul.f32 %v4931_v34, %v5895_v36 }
 0x248   : > { %4942 = vrsqrt.f32 %v1899_v26  ;;  %v1837_v13 = vsub.f32 %v1574_v45, %v1773_v60  ;;  %v5960_v58 = vpop.f32.mrb[64].mxu1  ;;  %4532 = vmatmul.mubr.msk.f32.gmra.mrb[118].mxu1 %vm1999_vm0, %v4929_v17 }
 0x249   : > { %v4933_v1 = vpop.eup %4932  ;;  %v1902_v5 = vadd.f32 1e-05, %v1838_v3  ;;  %v1776_v21 = vmul.f32 %v5960_v58, %v5960_v58  ;;  %v5965_v25 = vpop.f32.mrb[65].mxu1  ;;  %4635 = vmatprep.mubr.msk.f32.mxu0 %vm1999_vm0, %v2599_v20 }
 0x24a   : > { %v4935_v44 = vpop.eup %4934  ;;  %v1901_v11 = vadd.f32 1e-05, %v1837_v13  ;;  %v1775_v36 = vmul.f32 %v5965_v25, %v5965_v25  ;;  %v4444_v2 = vpop.f32.mrb[64].mxu0  ;;  %4636 = vmatmul.mubr.msk.f32.gmra.mrb[118].mxu0 %vm1999_vm0, %v2600_v32  ;;  %v2602_v34 = vmul.f32 %v4933_v1, %v5904_v23 }
 0x24b   : > { %4944 = vrsqrt.f32 %v1902_v5  ;;  %v1840_v17 = vsub.f32 %v4444_v2, %v1776_v21  ;;  %v1584_v26 = vpop.f32.mrb[65].mxu0  ;;  %4534 = vmatprep.mubr.msk.f32.mxu1 %vm1999_vm0, %v4935_v44  ;;  %v2601_v60 = vmul.f32 %v4935_v44, %v5909_v38 }
 0x24c   : > { %4946 = vrsqrt.f32 %v1901_v11  ;;  %v1839_v0 = vsub.f32 %v1584_v26, %v1775_v36  ;;  %v5974_v3 = vpop.f32.mrb[66].mxu1  ;;  %4535 = vmatmul.mubr.msk.f32.gmra.mrb[120].mxu1 %vm1999_vm0, %v4933_v1 }
 0x24d   : > { %v4937_v45 = vpop.eup %4936  ;;  %v1904_v20 = vadd.f32 1e-05, %v1840_v17  ;;  %v1778_v32 = vmul.f32 %v5974_v3, %v5974_v3  ;;  %v5979_v13 = vpop.f32.mrb[67].mxu1  ;;  %4638 = vmatprep.mubr.msk.f32.mxu0 %vm1999_vm0, %v2601_v60 }
 0x24e   : > { %v4939_v23 = vpop.eup %4938  ;;  %v1903_v5 = vadd.f32 1e-05, %v1839_v0  ;;  %v1777_v38 = vmul.f32 %v5979_v13, %v5979_v13  ;;  %v4447_v21 = vpop.f32.mrb[66].mxu0  ;;  %4639 = vmatmul.mubr.msk.f32.gmra.mrb[120].mxu0 %vm1999_vm0, %v2602_v34  ;;  %v2604_v44 = vmul.f32 %v4937_v45, %v5918_v46 }
 0x24f   : > { %4948 = vrsqrt.f32 %v1904_v20  ;;  %v1842_v1 = vsub.f32 %v4447_v21, %v1778_v32  ;;  %v1594_v11 = vpop.f32.mrb[67].mxu0  ;;  %4537 = vmatprep.mubr.msk.f32.mxu1 %vm1999_vm0, %v4939_v23  ;;  %v2603_v36 = vmul.f32 %v4939_v23, %v5923_v15 }
 0x250   : > { %4950 = vrsqrt.f32 %v1903_v5  ;;  %v1841_v2 = vsub.f32 %v1594_v11, %v1777_v38  ;;  %v5988_v17 = vpop.f32.mrb[68].mxu1  ;;  %4538 = vmatmul.mubr.msk.f32.gmra.mrb[122].mxu1 %vm1999_vm0, %v4937_v45 }
 0x251   : > { %v4941_v26 = vpop.eup %4940  ;;  %v1906_v60 = vadd.f32 1e-05, %v1842_v1  ;;  %v1780_v34 = vmul.f32 %v5988_v17, %v5988_v17  ;;  %v5993_v0 = vpop.f32.mrb[69].mxu1  ;;  %4641 = vmatprep.mubr.msk.f32.mxu0 %vm1999_vm0, %v2603_v36 }
 0x252   : > { %v4943_v46 = vpop.eup %4942  ;;  %v1905_v20 = vadd.f32 1e-05, %v1841_v2  ;;  %v1779_v15 = vmul.f32 %v5993_v0, %v5993_v0  ;;  %v4450_v32 = vpop.f32.mrb[68].mxu0  ;;  %4642 = vmatmul.mubr.msk.f32.gmra.mrb[122].mxu0 %vm1999_vm0, %v2604_v44  ;;  %v2606_v23 = vmul.f32 %v4941_v26, %v5932_v52 }
 0x253   : > { %4952 = vrsqrt.f32 %v1906_v60  ;;  %v1844_v45 = vsub.f32 %v4450_v32, %v1780_v34  ;;  %v1604_v5 = vpop.f32.mrb[69].mxu0  ;;  %4540 = vmatprep.mubr.msk.f32.mxu1 %vm1999_vm0, %v4943_v46  ;;  %v2605_v38 = vmul.f32 %v4943_v46, %v5937_v54 }
 0x254   : > { %4954 = vrsqrt.f32 %v1905_v20  ;;  %v1843_v21 = vsub.f32 %v1604_v5, %v1779_v15  ;;  %v6002_v1 = vpop.f32.mrb[70].mxu1  ;;  %4541 = vmatmul.mubr.msk.f32.gmra.mrb[124].mxu1 %vm1999_vm0, %v4941_v26 }
 0x255   : > { %v4945_v11 = vpop.eup %4944  ;;  %v1908_v36 = vadd.f32 1e-05, %v1844_v45  ;;  %v1782_v44 = vmul.f32 %v6002_v1, %v6002_v1  ;;  %v6007_v2 = vpop.f32.mrb[71].mxu1  ;;  %4644 = vmatprep.mubr.msk.f32.mxu0 %vm1999_vm0, %v2605_v38 }
 0x256   : > { %v4947_v52 = vpop.eup %4946  ;;  %v1907_v60 = vadd.f32 1e-05, %v1843_v21  ;;  %v1781_v54 = vmul.f32 %v6007_v2, %v6007_v2  ;;  %v4453_v34 = vpop.f32.mrb[70].mxu0  ;;  %4645 = vmatmul.mubr.msk.f32.gmra.mrb[124].mxu0 %vm1999_vm0, %v2606_v23  ;;  %v2608_v46 = vmul.f32 %v4945_v11, %v5946_v8 }
 0x257   : > { %4956 = vrsqrt.f32 %v1908_v36  ;;  %v1846_v26 = vsub.f32 %v4453_v34, %v1782_v44  ;;  %v1614_v20 = vpop.f32.mrb[71].mxu0  ;;  %4543 = vmatprep.mubr.msk.f32.mxu1 %vm1999_vm0, %v4947_v52  ;;  %v2607_v15 = vmul.f32 %v4947_v52, %v5951_v51 }
 0x258   : > { %4958 = vrsqrt.f32 %v1907_v60  ;;  %v1845_v32 = vsub.f32 %v1614_v20, %v1781_v54  ;;  %v6016_v45 = vpop.f32.mrb[72].mxu1  ;;  %4544 = vmatmul.mubr.msk.f32.gmra.mrb[126].mxu1 %vm1999_vm0, %v4945_v11 }
 0x259   : > { %v4949_v5 = vpop.eup %4948  ;;  %v1910_v38 = vadd.f32 1e-05, %v1846_v26  ;;  %v1784_v23 = vmul.f32 %v6016_v45, %v6016_v45  ;;  %v6021_v21 = vpop.f32.mrb[73].mxu1  ;;  %4647 = vmatprep.mubr.msk.f32.mxu0 %vm1999_vm0, %v2607_v15 }
 0x25a   : > { %v4951_v8 = vpop.eup %4950  ;;  %v1909_v36 = vadd.f32 1e-05, %v1845_v32  ;;  %v1783_v51 = vmul.f32 %v6021_v21, %v6021_v21  ;;  %v4456_v44 = vpop.f32.mrb[72].mxu0  ;;  %4648 = vmatmul.mubr.msk.f32.gmra.mrb[126].mxu0 %vm1999_vm0, %v2608_v46  ;;  %v2610_v52 = vmul.f32 %v4949_v5, %v5960_v58 }
 0x25b   : > { %4960 = vrsqrt.f32 %v1910_v38  ;;  %v1848_v11 = vsub.f32 %v4456_v44, %v1784_v23  ;;  %v1624_v60 = vpop.f32.mrb[73].mxu0  ;;  %4546 = vmatprep.mubr.msk.f32.mxu1 %vm1999_vm0, %v4951_v8  ;;  %v2609_v54 = vmul.f32 %v4951_v8, %v5965_v25 }
 0x25c   : > { %4962 = vrsqrt.f32 %v1909_v36  ;;  %v1847_v34 = vsub.f32 %v1624_v60, %v1783_v51  ;;  %v6030_v26 = vpop.f32.mrb[74].mxu1  ;;  %4547 = vmatmul.mubr.msk.f32.gmra.mrb[128].mxu1 %vm1999_vm0, %v4949_v5 }
 0x25d   : > { %v4953_v20 = vpop.eup %4952  ;;  %v1912_v15 = vadd.f32 1e-05, %v1848_v11  ;;  %v1786_v46 = vmul.f32 %v6030_v26, %v6030_v26  ;;  %v6035_v32 = vpop.f32.mrb[75].mxu1  ;;  %4650 = vmatprep.mubr.msk.f32.mxu0 %vm1999_vm0, %v2609_v54 }
 0x25e   : > { %v4955_v58 = vpop.eup %4954  ;;  %v1911_v38 = vadd.f32 1e-05, %v1847_v34  ;;  %v1785_v25 = vmul.f32 %v6035_v32, %v6035_v32  ;;  %v4459_v23 = vpop.f32.mrb[74].mxu0  ;;  %4651 = vmatmul.mubr.msk.f32.gmra.mrb[128].mxu0 %vm1999_vm0, %v2610_v52  ;;  %v2612_v8 = vmul.f32 %v4953_v20, %v5974_v3 }
 0x25f   : > { %4964 = vrsqrt.f32 %v1912_v15  ;;  %v1850_v5 = vsub.f32 %v4459_v23, %v1786_v46  ;;  %v1634_v36 = vpop.f32.mrb[75].mxu0  ;;  %4549 = vmatprep.mubr.msk.f32.mxu1 %vm1999_vm0, %v4955_v58  ;;  %v2611_v51 = vmul.f32 %v4955_v58, %v5979_v13 }
 0x260   : > { %4966 = vrsqrt.f32 %v1911_v38  ;;  %v1849_v44 = vsub.f32 %v1634_v36, %v1785_v25  ;;  %v6044_v11 = vpop.f32.mrb[76].mxu1  ;;  %4550 = vmatmul.mubr.msk.f32.gmra.mrb[130].mxu1 %vm1999_vm0, %v4953_v20 }
 0x261   : > { %v4957_v60 = vpop.eup %4956  ;;  %v1914_v54 = vadd.f32 1e-05, %v1850_v5  ;;  %v1788_v52 = vmul.f32 %v6044_v11, %v6044_v11  ;;  %v6049_v34 = vpop.f32.mrb[77].mxu1  ;;  %4653 = vmatprep.mubr.msk.f32.mxu0 %vm1999_vm0, %v2611_v51 }
 0x262   : > { %v4959_v3 = vpop.eup %4958  ;;  %v1913_v15 = vadd.f32 1e-05, %v1849_v44  ;;  %v1787_v13 = vmul.f32 %v6049_v34, %v6049_v34  ;;  %v4462_v46 = vpop.f32.mrb[76].mxu0  ;;  %4654 = vmatmul.mubr.msk.f32.gmra.mrb[130].mxu0 %vm1999_vm0, %v2612_v8  ;;  %v2614_v58 = vmul.f32 %v4957_v60, %v5988_v17 }
 0x263   : > { %4968 = vrsqrt.f32 %v1914_v54  ;;  %v1852_v20 = vsub.f32 %v4462_v46, %v1788_v52  ;;  %v1644_v38 = vpop.f32.mrb[77].mxu0  ;;  %4552 = vmatprep.mubr.msk.f32.mxu1 %vm1999_vm0, %v4959_v3  ;;  %v2613_v25 = vmul.f32 %v4959_v3, %v5993_v0 }
 0x264   : > { %4970 = vrsqrt.f32 %v1913_v15  ;;  %v1851_v23 = vsub.f32 %v1644_v38, %v1787_v13  ;;  %v6058_v5 = vpop.f32.mrb[78].mxu1  ;;  %4553 = vmatmul.mubr.msk.f32.gmra.mrb[132].mxu1 %vm1999_vm0, %v4957_v60 }
 0x265   : > { %v4961_v36 = vpop.eup %4960  ;;  %v1916_v51 = vadd.f32 1e-05, %v1852_v20  ;;  %v1790_v8 = vmul.f32 %v6058_v5, %v6058_v5  ;;  %v6063_v44 = vpop.f32.mrb[79].mxu1  ;;  %4656 = vmatprep.mubr.msk.f32.mxu0 %vm1999_vm0, %v2613_v25 }
 0x266   : > { %v4963_v17 = vpop.eup %4962  ;;  %v1915_v54 = vadd.f32 1e-05, %v1851_v23  ;;  %v1789_v0 = vmul.f32 %v6063_v44, %v6063_v44  ;;  %v4465_v52 = vpop.f32.mrb[78].mxu0  ;;  %4657 = vmatmul.mubr.msk.f32.gmra.mrb[132].mxu0 %vm1999_vm0, %v2614_v58  ;;  %v2616_v3 = vmul.f32 %v4961_v36, %v6002_v1 }
 0x267   : > { %4972 = vrsqrt.f32 %v1916_v51  ;;  %v1854_v60 = vsub.f32 %v4465_v52, %v1790_v8  ;;  %v1654_v15 = vpop.f32.mrb[79].mxu0  ;;  %4555 = vmatprep.mubr.msk.f32.mxu1 %vm1999_vm0, %v4963_v17  ;;  %v2615_v13 = vmul.f32 %v4963_v17, %v6007_v2 }
 0x268   : > { %4974 = vrsqrt.f32 %v1915_v54  ;;  %v1853_v46 = vsub.f32 %v1654_v15, %v1789_v0  ;;  %v6072_v20 = vpop.f32.mrb[80].mxu1  ;;  %4556 = vmatmul.mubr.msk.f32.gmra.mrb[134].mxu1 %vm1999_vm0, %v4961_v36 }
 0x269   : > { %v4965_v38 = vpop.eup %4964  ;;  %v1918_v25 = vadd.f32 1e-05, %v1854_v60  ;;  %v1792_v58 = vmul.f32 %v6072_v20, %v6072_v20  ;;  %v6077_v23 = vpop.f32.mrb[81].mxu1  ;;  %4659 = vmatprep.mubr.msk.f32.mxu0 %vm1999_vm0, %v2615_v13 }
 0x26a   : > { %v4967_v1 = vpop.eup %4966  ;;  %v1917_v51 = vadd.f32 1e-05, %v1853_v46  ;;  %v1791_v2 = vmul.f32 %v6077_v23, %v6077_v23  ;;  %v4468_v8 = vpop.f32.mrb[80].mxu0  ;;  %4660 = vmatmul.mubr.msk.f32.gmra.mrb[134].mxu0 %vm1999_vm0, %v2616_v3  ;;  %v2618_v17 = vmul.f32 %v4965_v38, %v6016_v45 }
 0x26b   : > { %4976 = vrsqrt.f32 %v1918_v25  ;;  %v1856_v36 = vsub.f32 %v4468_v8, %v1792_v58  ;;  %v1664_v54 = vpop.f32.mrb[81].mxu0  ;;  %4558 = vmatprep.mubr.msk.f32.mxu1 %vm1999_vm0, %v4967_v1  ;;  %v2617_v0 = vmul.f32 %v4967_v1, %v6021_v21 }
 0x26c   : > { %4978 = vrsqrt.f32 %v1917_v51  ;;  %v1855_v52 = vsub.f32 %v1664_v54, %v1791_v2  ;;  %v6086_v60 = vpop.f32.mrb[82].mxu1  ;;  %4559 = vmatmul.mubr.msk.f32.gmra.mrb[136].mxu1 %vm1999_vm0, %v4965_v38 }
 0x26d   : > { %v4969_v15 = vpop.eup %4968  ;;  %v1920_v13 = vadd.f32 1e-05, %v1856_v36  ;;  %v1794_v3 = vmul.f32 %v6086_v60, %v6086_v60  ;;  %v6091_v46 = vpop.f32.mrb[83].mxu1  ;;  %4662 = vmatprep.mubr.msk.f32.mxu0 %vm1999_vm0, %v2617_v0 }
 0x26e   : > { %v4971_v45 = vpop.eup %4970  ;;  %v1919_v25 = vadd.f32 1e-05, %v1855_v52  ;;  %v1793_v21 = vmul.f32 %v6091_v46, %v6091_v46  ;;  %v4471_v58 = vpop.f32.mrb[82].mxu0  ;;  %4663 = vmatmul.mubr.msk.f32.gmra.mrb[136].mxu0 %vm1999_vm0, %v2618_v17  ;;  %v2620_v1 = vmul.f32 %v4969_v15, %v6030_v26 }
 0x26f   : > { %4980 = vrsqrt.f32 %v1920_v13  ;;  %v1858_v38 = vsub.f32 %v4471_v58, %v1794_v3  ;;  %v1674_v51 = vpop.f32.mrb[83].mxu0  ;;  %4561 = vmatprep.mubr.msk.f32.mxu1 %vm1999_vm0, %v4971_v45  ;;  %v2619_v2 = vmul.f32 %v4971_v45, %v6035_v32 }
 0x270   : > { %4982 = vrsqrt.f32 %v1919_v25  ;;  %v1857_v8 = vsub.f32 %v1674_v51, %v1793_v21  ;;  %v6100_v36 = vpop.f32.mrb[84].mxu1  ;;  %4562 = vmatmul.mubr.msk.f32.gmra.mrb[138].mxu1 %vm1999_vm0, %v4969_v15 }
 0x271   : > { %v4973_v54 = vpop.eup %4972  ;;  %v1922_v0 = vadd.f32 1e-05, %v1858_v38  ;;  %v1796_v17 = vmul.f32 %v6100_v36, %v6100_v36  ;;  %v6105_v52 = vpop.f32.mrb[85].mxu1  ;;  %4665 = vmatprep.mubr.msk.f32.mxu0 %vm1999_vm0, %v2619_v2 }
 0x272   : > { %v4975_v26 = vpop.eup %4974  ;;  %v1921_v13 = vadd.f32 1e-05, %v1857_v8  ;;  %v1795_v32 = vmul.f32 %v6105_v52, %v6105_v52  ;;  %v4474_v3 = vpop.f32.mrb[84].mxu0  ;;  %4666 = vmatmul.mubr.msk.f32.gmra.mrb[138].mxu0 %vm1999_vm0, %v2620_v1  ;;  %v2622_v45 = vmul.f32 %v4973_v54, %v6044_v11 }
 0x273   : > { %4984 = vrsqrt.f32 %v1922_v0  ;;  %v1860_v15 = vsub.f32 %v4474_v3, %v1796_v17  ;;  %v1684_v25 = vpop.f32.mrb[85].mxu0  ;;  %4564 = vmatprep.mubr.msk.f32.mxu1 %vm1999_vm0, %v4975_v26  ;;  %v2621_v21 = vmul.f32 %v4975_v26, %v6049_v34 }
 0x274   : > { %4986 = vrsqrt.f32 %v1921_v13  ;;  %v1859_v58 = vsub.f32 %v1684_v25, %v1795_v32  ;;  %v6114_v38 = vpop.f32.mrb[86].mxu1  ;;  %4565 = vmatmul.mubr.msk.f32.gmra.mrb[140].mxu1 %vm1999_vm0, %v4973_v54 }
 0x275   : > { %v4977_v51 = vpop.eup %4976  ;;  %v1924_v2 = vadd.f32 1e-05, %v1860_v15  ;;  %v1798_v1 = vmul.f32 %v6114_v38, %v6114_v38  ;;  %v6119_v8 = vpop.f32.mrb[87].mxu1  ;;  %4668 = vmatprep.mubr.msk.f32.mxu0 %vm1999_vm0, %v2621_v21 }
 0x276   : > { %v4979_v11 = vpop.eup %4978  ;;  %v1923_v0 = vadd.f32 1e-05, %v1859_v58  ;;  %v1797_v34 = vmul.f32 %v6119_v8, %v6119_v8  ;;  %v4477_v17 = vpop.f32.mrb[86].mxu0  ;;  %4669 = vmatmul.mubr.msk.f32.gmra.mrb[140].mxu0 %vm1999_vm0, %v2622_v45  ;;  %v2624_v26 = vmul.f32 %v4977_v51, %v6058_v5 }
 0x277   : > { %4988 = vrsqrt.f32 %v1924_v2  ;;  %v1862_v54 = vsub.f32 %v4477_v17, %v1798_v1  ;;  %v1694_v13 = vpop.f32.mrb[87].mxu0  ;;  %4567 = vmatprep.mubr.msk.f32.mxu1 %vm1999_vm0, %v4979_v11  ;;  %v2623_v32 = vmul.f32 %v4979_v11, %v6063_v44 }
 0x278   : > { %4990 = vrsqrt.f32 %v1923_v0  ;;  %v1861_v3 = vsub.f32 %v1694_v13, %v1797_v34  ;;  %v6128_v15 = vpop.f32.mrb[88].mxu1  ;;  %4568 = vmatmul.mubr.msk.f32.gmra.mrb[142].mxu1 %vm1999_vm0, %v4977_v51 }
 0x279   : > { %v4981_v25 = vpop.eup %4980  ;;  %v1926_v21 = vadd.f32 1e-05, %v1862_v54  ;;  %v1800_v45 = vmul.f32 %v6128_v15, %v6128_v15  ;;  %v6133_v58 = vpop.f32.mrb[89].mxu1  ;;  %4671 = vmatprep.mubr.msk.f32.mxu0 %vm1999_vm0, %v2623_v32 }
 0x27a   : > { %v4983_v5 = vpop.eup %4982  ;;  %v1925_v2 = vadd.f32 1e-05, %v1861_v3  ;;  %v1799_v44 = vmul.f32 %v6133_v58, %v6133_v58  ;;  %v4480_v1 = vpop.f32.mrb[88].mxu0  ;;  %4672 = vmatmul.mubr.msk.f32.gmra.mrb[142].mxu0 %vm1999_vm0, %v2624_v26  ;;  %v2626_v11 = vmul.f32 %v4981_v25, %v6072_v20 }
 0x27b   : > { %4992 = vrsqrt.f32 %v1926_v21  ;;  %v1864_v51 = vsub.f32 %v4480_v1, %v1800_v45  ;;  %v1704_v0 = vpop.f32.mrb[89].mxu0  ;;  %4570 = vmatprep.mubr.msk.f32.mxu1 %vm1999_vm0, %v4983_v5  ;;  %v2625_v34 = vmul.f32 %v4983_v5, %v6077_v23 }
 0x27c   : > { %4994 = vrsqrt.f32 %v1925_v2  ;;  %v1863_v17 = vsub.f32 %v1704_v0, %v1799_v44  ;;  %v6142_v54 = vpop.f32.mrb[90].mxu1  ;;  %4571 = vmatmul.mubr.msk.f32.gmra.mrb[144].mxu1 %vm1999_vm0, %v4981_v25 }
 0x27d   : > { %v4985_v13 = vpop.eup %4984  ;;  %v1928_v32 = vadd.f32 1e-05, %v1864_v51  ;;  %v1802_v26 = vmul.f32 %v6142_v54, %v6142_v54  ;;  %v6147_v3 = vpop.f32.mrb[91].mxu1  ;;  %4674 = vmatprep.mubr.msk.f32.mxu0 %vm1999_vm0, %v2625_v34 }
 0x27e   : > { %v4987_v20 = vpop.eup %4986  ;;  %v1927_v21 = vadd.f32 1e-05, %v1863_v17  ;;  %v1801_v23 = vmul.f32 %v6147_v3, %v6147_v3  ;;  %v4483_v45 = vpop.f32.mrb[90].mxu0  ;;  %4675 = vmatmul.mubr.msk.f32.gmra.mrb[144].mxu0 %vm1999_vm0, %v2626_v11  ;;  %v2628_v5 = vmul.f32 %v4985_v13, %v6086_v60 }
 0x27f   : > { %4996 = vrsqrt.f32 %v1928_v32  ;;  %v1866_v25 = vsub.f32 %v4483_v45, %v1802_v26  ;;  %v1714_v2 = vpop.f32.mrb[91].mxu0  ;;  %4573 = vmatprep.mubr.msk.f32.mxu1 %vm1999_vm0, %v4987_v20  ;;  %v2627_v44 = vmul.f32 %v4987_v20, %v6091_v46 }
 0x280   : > { %4998 = vrsqrt.f32 %v1927_v21  ;;  %v1865_v1 = vsub.f32 %v1714_v2, %v1801_v23  ;;  %v6156_v51 = vpop.f32.mrb[92].mxu1  ;;  %4574 = vmatmul.mubr.msk.f32.gmra.mrb[146].mxu1 %vm1999_vm0, %v4985_v13 }
 0x281   : > { %v4989_v0 = vpop.eup %4988  ;;  %v1930_v34 = vadd.f32 1e-05, %v1866_v25  ;;  %v1804_v11 = vmul.f32 %v6156_v51, %v6156_v51  ;;  %v1275_v17 = vpop.f32.mrb[93].mxu1  ;;  %4677 = vmatprep.mubr.msk.f32.mxu0 %vm1999_vm0, %v2627_v44 }
 0x282   : > { %v4991_v60 = vpop.eup %4990  ;;  %v1929_v32 = vadd.f32 1e-05, %v1865_v1  ;;  %v1803_v26 = vmul.f32 %v1275_v17, %v1275_v17  ;;  %v4486_v45 = vpop.f32.mrb[92].mxu0  ;;  %4678 = vmatmul.mubr.msk.f32.gmra.mrb[146].mxu0 %vm1999_vm0, %v2628_v5  ;;  %v2630_v46 = vmul.f32 %v4989_v0, %v6100_v36 }
 0x283   : > { %5000 = vrsqrt.f32 %v1930_v34  ;;  %v1868_v20 = vsub.f32 %v4486_v45, %v1804_v11  ;;  %v1724_v21 = vpop.f32.mrb[93].mxu0  ;;  %4576 = vmatprep.mubr.msk.f32.mxu1 %vm1999_vm0, %v4991_v60  ;;  %v2629_v13 = vmul.f32 %v4991_v60, %v6105_v52 }
 0x284   : > { %5002 = vrsqrt.f32 %v1929_v32  ;;  %v1867_v23 = vsub.f32 %v1724_v21, %v1803_v26  ;;  %v4361_v25 = vpop.f32.mrb[94].mxu1  ;;  %4577 = vmatmul.mubr.msk.f32.gmra.mrb[148].mxu1 %vm1999_vm0, %v4989_v0 }
 0x285   : > { %v4993_v2 = vpop.eup %4992  ;;  %v1932_v44 = vadd.f32 1e-05, %v1868_v20  ;;  %v1806_v1 = vmul.f32 %v4361_v25, %v4361_v25  ;;  %v1285_v48 = vpop.f32.mrb[95].mxu1  ;;  %4680 = vmatprep.mubr.msk.f32.mxu0 %vm1999_vm0, %v2629_v13 }
 0x286   : > { %v4995_v5 = vpop.eup %4994  ;;  %v1931_v36 = vadd.f32 1e-05, %v1867_v23  ;;  %v1805_v34 = vmul.f32 %v1285_v48, %v1285_v48  ;;  %v4489_v11 = vpop.f32.mrb[94].mxu0  ;;  %4681 = vmatmul.mubr.msk.f32.gmra.mrb[148].mxu0 %vm1999_vm0, %v2630_v46  ;;  %v2632_v45 = vmul.f32 %v4993_v2, %v6114_v38 }
 0x287   : > { %5004 = vrsqrt.f32 %v1932_v44  ;;  %v1870_v52 = vsub.f32 %v4489_v11, %v1806_v1  ;;  %v1734_v60 = vpop.f32.mrb[95].mxu0  ;;  %4579 = vmatprep.mubr.msk.f32.mxu1 %vm1999_vm0, %v4995_v5  ;;  %v2631_v0 = vmul.f32 %v4995_v5, %v6119_v8 }
 0x288   : > { %5006 = vrsqrt.f32 %v1931_v36  ;;  %v1869_v32 = vsub.f32 %v1734_v60, %v1805_v34  ;;  %4580 = vmatmul.mubr.msk.f32.gmra.mrb[150].mxu1 %vm1999_vm0, %v4993_v2 }
 0x289   : > { %v4997_v26 = vpop.eup %4996  ;;  %v1934_v20 = vadd.f32 1e-05, %v1870_v52  ;;  %4683 = vmatprep.mubr.msk.f32.mxu0 %vm1999_vm0, %v2631_v0 }
 0x28a   : > { %v4999_v21 = vpop.eup %4998  ;;  %v1933_v13 = vadd.f32 1e-05, %v1869_v32  ;;  %4684 = vmatmul.mubr.msk.f32.gmra.mrb[150].mxu0 %vm1999_vm0, %v2632_v45  ;;  %v2634_v38 = vmul.f32 %v4997_v26, %v6128_v15 }
 0x28b   : > { %5008 = vrsqrt.f32 %v1934_v20  ;;  %4582 = vmatprep.mubr.msk.f32.mxu1 %vm1999_vm0, %v4999_v21  ;;  %v2633_v46 = vmul.f32 %v4999_v21, %v6133_v58 }
 0x28c   : > { %5010 = vrsqrt.f32 %v1933_v13  ;;  %4583 = vmatmul.mubr.msk.f32.gmra.mrb[152].mxu1 %vm1999_vm0, %v4997_v26 }
 0x28d   : > { %v5001_v8 = vpop.eup %5000  ;;  %4686 = vmatprep.mubr.msk.f32.mxu0 %vm1999_vm0, %v2633_v46 }
 0x28e   : > { %v5003_v23 = vpop.eup %5002  ;;  %4687 = vmatmul.mubr.msk.f32.gmra.mrb[152].mxu0 %vm1999_vm0, %v2634_v38  ;;  %v2636_v2 = vmul.f32 %v5001_v8, %v6142_v54 }
 0x28f   : > { %4585 = vmatprep.mubr.msk.f32.mxu1 %vm1999_vm0, %v5003_v23  ;;  %v2635_v15 = vmul.f32 %v5003_v23, %v6147_v3 }
 0x290   : > { %4586 = vmatmul.mubr.msk.f32.gmra.mrb[154].mxu1 %vm1999_vm0, %v5001_v8 }
 0x291   : > { %v5005_v44 = vpop.eup %5004  ;;  %4689 = vmatprep.mubr.msk.f32.mxu0 %vm1999_vm0, %v2635_v15 }
 0x292   : > { %v5007_v58 = vpop.eup %5006  ;;  %4690 = vmatmul.mubr.msk.f32.gmra.mrb[154].mxu0 %vm1999_vm0, %v2636_v2  ;;  %v2638_v1 = vmul.f32 %v5005_v44, %v6156_v51 }
 0x293   : > { %4588 = vmatprep.mubr.msk.f32.mxu1 %vm1999_vm0, %v5007_v58  ;;  %v2637_v5 = vmul.f32 %v5007_v58, %v1275_v17  ;;  %v6199_v17 = vld [vmem:[%s6450_s3] ss:$0 sm:$0xff] }
 0x294   : > { %4589 = vmatmul.mubr.msk.f32.gmra.mrb[156].mxu1 %vm1999_vm0, %v5005_v44 }
 0x295   : > { %v5009_v54 = vpop.eup %5008  ;;  %4692 = vmatprep.mubr.msk.f32.mxu0 %vm1999_vm0, %v2637_v5 }
 0x296   : > { %v5011_v3 = vpop.eup %5010  ;;  %4693 = vmatmul.mubr.msk.f32.gmra.mrb[156].mxu0 %vm1999_vm0, %v2638_v1  ;;  %v2640_v36 = vmul.f32 %v5009_v54, %v4361_v25 }
 0x297   : > { %4591 = vmatprep.mubr.msk.f32.mxu1 %vm1999_vm0, %v5011_v3  ;;  %v2639_v34 = vmul.f32 %v5011_v3, %v1285_v48 }
 0x298   : > { %4592 = vmatmul.mubr.msk.f32.gmra.mrb[158].mxu1 %vm1999_vm0, %v5009_v54 }
 0x299   : > { %4695 = vmatprep.mubr.msk.f32.mxu0 %vm1999_vm0, %v2639_v34 }
 0x29a   : > { %4696 = vmatmul.mubr.msk.f32.gmra.mrb[158].mxu0 %vm1999_vm0, %v2640_v36 }
 0x2ef   : > { %v4500_v51 = vpop.f32.mrb[96].mxu1 }
 0x2f0   : > { %v2258_v11 = vpop.f32.mrb[97].mxu1  ;;  %v3219_v52 = vmul.f32 %v4500_v51, %v5395_v16 }
 0x2f1   : > { %v4604_v45 = vpop.f32.mrb[96].mxu0  ;;  %v3218_v60 = vmul.f32 %v2258_v11, %v5386_v9 }
 0x2f2   : > { %v3290_v25 = vsub.f32 %v6199_v17, %v4604_v45  ;;  %v2899_v48 = vpop.f32.mrb[97].mxu0 }
 0x2f3   : > { %v3289_v0 = vsub.f32 %v6199_v17, %v2899_v48  ;;  %v4503_v32 = vpop.f32.mrb[98].mxu1 }
 0x2f4   : > { %v3354_v26 = vadd.f32 %v3290_v25, %v3219_v52  ;;  %v2268_v20 = vpop.f32.mrb[99].mxu1  ;;  %v3221_v46 = vmul.f32 %v4503_v32, %v5410_v22 }
 0x2f5   : > { %v3353_v21 = vadd.f32 %v3289_v0, %v3218_v60  ;;  %v4607_v13 = vpop.f32.mrb[98].mxu0  ;;  %v3220_v2 = vmul.f32 %v2268_v20, %v5389_v12 }
 0x2f6   : > { %v3418_v38 = vmax.f32 %v3354_v26, 0.0  ;;  %v3292_v8 = vsub.f32 %v6199_v17, %v4607_v13  ;;  %v2909_v23 = vpop.f32.mrb[99].mxu0 }
 0x2f7   : > { %v3417_v16 = vmax.f32 %v3353_v21, 0.0  ;;  %v3291_v15 = vsub.f32 %v6199_v17, %v2909_v23  ;;  %v4506_v44 = vpop.f32.mrb[100].mxu1 }
 0x2f8   : > { %3482 = vst [vmem:[%s6210_s17 + $0x8] sm:$0xff] %v3418_v38  ;;  %v3356_v9 = vadd.f32 %v3292_v8, %v3221_v46  ;;  %v2278_v58 = vpop.f32.mrb[101].mxu1  ;;  %v3223_v54 = vmul.f32 %v4506_v44, %v5437_v39 }
 0x2f9   : > { %3481 = vst [vmem:[%s6210_s17] sm:$0xff] %v3417_v16  ;;  %v3355_v22 = vadd.f32 %v3291_v15, %v3220_v2  ;;  %v4610_v1 = vpop.f32.mrb[100].mxu0  ;;  %v3222_v34 = vmul.f32 %v2278_v58, %v5422_v30 }
 0x2fa   : > { %v3420_v5 = vmax.f32 %v3356_v9, 0.0  ;;  %v3294_v12 = vsub.f32 %v6199_v17, %v4610_v1  ;;  %v2919_v3 = vpop.f32.mrb[101].mxu0 }
 0x2fb   : > { %v3419_v36 = vmax.f32 %v3355_v22, 0.0  ;;  %v3293_v51 = vsub.f32 %v6199_v17, %v2919_v3  ;;  %v4509_v11 = vpop.f32.mrb[102].mxu1 }
 0x2fc   : > { %3484 = vst [vmem:[%s6210_s17 + $0x18] sm:$0xff] %v3420_v5  ;;  %v3358_v45 = vadd.f32 %v3294_v12, %v3223_v54  ;;  %v2288_v52 = vpop.f32.mrb[103].mxu1  ;;  %v3225_v39 = vmul.f32 %v4509_v11, %v5446_v42 }
 0x2fd   : > { %3483 = vst [vmem:[%s6210_s17 + $0x10] sm:$0xff] %v3419_v36  ;;  %v3357_v25 = vadd.f32 %v3293_v51, %v3222_v34  ;;  %v4613_v48 = vpop.f32.mrb[102].mxu0  ;;  %v3224_v30 = vmul.f32 %v2288_v52, %v5431_v35 }
 0x2fe   : > { %v3422_v60 = vmax.f32 %v3358_v45, 0.0  ;;  %v3296_v0 = vsub.f32 %v6199_v17, %v4613_v48  ;;  %v2929_v32 = vpop.f32.mrb[103].mxu0 }
 0x2ff   : > { %v3421_v26 = vmax.f32 %v3357_v25, 0.0  ;;  %v3295_v20 = vsub.f32 %v6199_v17, %v2929_v32  ;;  %v4512_v21 = vpop.f32.mrb[104].mxu1 }
 0x300   : > { %3486 = vst [vmem:[%s6210_s17 + $0x28] sm:$0xff] %v3422_v60  ;;  %v3360_v13 = vadd.f32 %v3296_v0, %v3225_v39  ;;  %v2298_v38 = vpop.f32.mrb[105].mxu1  ;;  %v3227_v42 = vmul.f32 %v4512_v21, %v5473_v59 }
 0x301   : > { %3485 = vst [vmem:[%s6210_s17 + $0x20] sm:$0xff] %v3421_v26  ;;  %v3359_v46 = vadd.f32 %v3295_v20, %v3224_v30  ;;  %v4616_v8 = vpop.f32.mrb[104].mxu0  ;;  %v3226_v35 = vmul.f32 %v2298_v38, %v5458_v50 }
 0x302   : > { %v3424_v23 = vmax.f32 %v3360_v13, 0.0  ;;  %v3298_v16 = vsub.f32 %v6199_v17, %v4616_v8  ;;  %v2939_v2 = vpop.f32.mrb[105].mxu0 }
 0x303   : > { %v3423_v15 = vmax.f32 %v3359_v46, 0.0  ;;  %v3297_v44 = vsub.f32 %v6199_v17, %v2939_v2  ;;  %v4515_v9 = vpop.f32.mrb[106].mxu1 }
 0x304   : > { %3488 = vst [vmem:[%s6210_s17 + $0x38] sm:$0xff] %v3424_v23  ;;  %v3362_v58 = vadd.f32 %v3298_v16, %v3227_v42  ;;  %v2308_v22 = vpop.f32.mrb[107].mxu1  ;;  %v3229_v59 = vmul.f32 %v4515_v9, %v5482_v62 }
 0x305   : > { %3487 = vst [vmem:[%s6210_s17 + $0x30] sm:$0xff] %v3423_v15  ;;  %v3361_v1 = vadd.f32 %v3297_v44, %v3226_v35  ;;  %v4619_v5 = vpop.f32.mrb[106].mxu0  ;;  %v3228_v50 = vmul.f32 %v2308_v22, %v5467_v55 }
 0x306   : > { %v3426_v54 = vmax.f32 %v3362_v58, 0.0  ;;  %v3300_v12 = vsub.f32 %v6199_v17, %v4619_v5  ;;  %v2949_v3 = vpop.f32.mrb[107].mxu0 }
 0x307   : > { %v3425_v36 = vmax.f32 %v3361_v1, 0.0  ;;  %v3299_v34 = vsub.f32 %v6199_v17, %v2949_v3  ;;  %v4518_v51 = vpop.f32.mrb[108].mxu1 }
 0x308   : > { %3490 = vst [vmem:[%s6210_s17 + $0x48] sm:$0xff] %v3426_v54  ;;  %v3364_v11 = vadd.f32 %v3300_v12, %v3229_v59  ;;  %v2318_v45 = vpop.f32.mrb[109].mxu1  ;;  %v3231_v62 = vmul.f32 %v4518_v51, %v5509_v24 }
 0x309   : > { %3489 = vst [vmem:[%s6210_s17 + $0x40] sm:$0xff] %v3425_v36  ;;  %v3363_v52 = vadd.f32 %v3299_v34, %v3228_v50  ;;  %v4622_v25 = vpop.f32.mrb[108].mxu0  ;;  %v3230_v55 = vmul.f32 %v2318_v45, %v5494_v10 }
 0x30a   : > { %v3428_v48 = vmax.f32 %v3364_v11, 0.0  ;;  %v3302_v60 = vsub.f32 %v6199_v17, %v4622_v25  ;;  %v2959_v39 = vpop.f32.mrb[109].mxu0 }
 0x30b   : > { %v3427_v0 = vmax.f32 %v3363_v52, 0.0  ;;  %v3301_v32 = vsub.f32 %v6199_v17, %v2959_v39  ;;  %v4521_v26 = vpop.f32.mrb[110].mxu1 }
 0x30c   : > { %3492 = vst [vmem:[%s6210_s17 + $0x58] sm:$0xff] %v3428_v48  ;;  %v3366_v30 = vadd.f32 %v3302_v60, %v3231_v62  ;;  %v2328_v20 = vpop.f32.mrb[111].mxu1  ;;  %v3233_v24 = vmul.f32 %v4521_v26, %v5518_v27  ;;  %v6516_v26 = vld [vmem:[#allocation18_spill] sm:$0xff] }
 0x30d   : > { %3491 = vst [vmem:[%s6210_s17 + $0x50] sm:$0xff] %v3427_v0  ;;  %v3365_v21 = vadd.f32 %v3301_v32, %v3230_v55  ;;  %v4625_v13 = vpop.f32.mrb[110].mxu0  ;;  %v3232_v10 = vmul.f32 %v2328_v20, %v5503_v19 }
 0x30e   : > { %v3430_v38 = vmax.f32 %v3366_v30, 0.0  ;;  %v3304_v46 = vsub.f32 %v6199_v17, %v4625_v13  ;;  %v2969_v8 = vpop.f32.mrb[111].mxu0 }
 0x30f   : > { %v3429_v23 = vmax.f32 %v3365_v21, 0.0  ;;  %v3303_v42 = vsub.f32 %v6199_v17, %v2969_v8  ;;  %v4524_v16 = vpop.f32.mrb[112].mxu1  ;;  %v6517_v8 = vld [vmem:[#allocation23_spill] sm:$0xff] }
 0x310   : > { %3494 = vst [vmem:[%s6210_s17 + $0x68] sm:$0xff] %v3430_v38  ;;  %v3368_v2 = vadd.f32 %v3304_v46, %v3233_v24  ;;  %v2338_v15 = vpop.f32.mrb[113].mxu1  ;;  %v3235_v27 = vmul.f32 %v4524_v16, %v5545_v56  ;;  %v6518_v16 = vld [vmem:[#allocation20_spill] sm:$0xff] }
 0x311   : > { %3493 = vst [vmem:[%s6210_s17 + $0x60] sm:$0xff] %v3429_v23  ;;  %v3367_v35 = vadd.f32 %v3303_v42, %v3232_v10  ;;  %v4628_v44 = vpop.f32.mrb[112].mxu0  ;;  %v3234_v19 = vmul.f32 %v2338_v15, %v5530_v43 }
 0x312   : > { %v3432_v9 = vmax.f32 %v3368_v2, 0.0  ;;  %v3306_v58 = vsub.f32 %v6199_v17, %v4628_v44  ;;  %v2979_v22 = vpop.f32.mrb[113].mxu0 }
 0x313   : > { %v3431_v1 = vmax.f32 %v3367_v35, 0.0  ;;  %v3305_v5 = vsub.f32 %v6199_v17, %v2979_v22  ;;  %v4527_v54 = vpop.f32.mrb[114].mxu1 }
 0x314   : > { %3496 = vst [vmem:[%s6210_s17 + $0x78] sm:$0xff] %v3432_v9  ;;  %v3370_v59 = vadd.f32 %v3306_v58, %v3235_v27  ;;  %v2348_v12 = vpop.f32.mrb[115].mxu1  ;;  %v3237_v56 = vmul.f32 %v4527_v54, %v5554_v63 }
 0x315   : > { %3495 = vst [vmem:[%s6210_s17 + $0x70] sm:$0xff] %v3431_v1  ;;  %v3369_v3 = vadd.f32 %v3305_v5, %v3234_v19  ;;  %v4631_v36 = vpop.f32.mrb[114].mxu0  ;;  %v3236_v43 = vmul.f32 %v2348_v12, %v5539_v49  ;;  %v6519_v1 = vld [vmem:[#allocation29_spill] sm:$0xff] }
 0x316   : > { %v3434_v50 = vmax.f32 %v3370_v59, 0.0  ;;  %v3308_v34 = vsub.f32 %v6199_v17, %v4631_v36  ;;  %v2989_v51 = vpop.f32.mrb[115].mxu0  ;;  %v6520_v12 = vld [vmem:[#allocation25_spill] sm:$0xff] }
 0x317   : > { %v3433_v11 = vmax.f32 %v3369_v3, 0.0  ;;  %v3307_v45 = vsub.f32 %v6199_v17, %v2989_v51  ;;  %v4530_v52 = vpop.f32.mrb[116].mxu1 }
 0x318   : > { %3498 = vst [vmem:[%s6210_s17 + $0x88] sm:$0xff] %v3434_v50  ;;  %v3372_v25 = vadd.f32 %v3308_v34, %v3237_v56  ;;  %v2358_v48 = vpop.f32.mrb[117].mxu1  ;;  %v3239_v63 = vmul.f32 %v4530_v52, %v5581_v40 }
 0x319   : > { %3497 = vst [vmem:[%s6210_s17 + $0x80] sm:$0xff] %v3433_v11  ;;  %v3371_v62 = vadd.f32 %v3307_v45, %v3236_v43  ;;  %v4634_v60 = vpop.f32.mrb[116].mxu0  ;;  %v3238_v49 = vmul.f32 %v2358_v48, %v6516_v26  ;;  %v6521_v45 = vld [vmem:[#allocation31_spill] sm:$0xff] }
 0x31a   : > { %v3436_v39 = vmax.f32 %v3372_v25, 0.0  ;;  %v3310_v0 = vsub.f32 %v6199_v17, %v4634_v60  ;;  %v2999_v55 = vpop.f32.mrb[117].mxu0  ;;  %v6522_v60 = vld [vmem:[#allocation27_spill] sm:$0xff] }
 0x31b   : > { %v3435_v32 = vmax.f32 %v3371_v62, 0.0  ;;  %v3309_v30 = vsub.f32 %v6199_v17, %v2999_v55  ;;  %v4533_v20 = vpop.f32.mrb[118].mxu1 }
 0x31c   : > { %3500 = vst [vmem:[%s6210_s17 + $0x98] sm:$0xff] %v3436_v39  ;;  %v3374_v21 = vadd.f32 %v3310_v0, %v3239_v63  ;;  %v2368_v13 = vpop.f32.mrb[119].mxu1  ;;  %v3241_v40 = vmul.f32 %v4533_v20, %v6517_v8 }
 0x31d   : > { %3499 = vst [vmem:[%s6210_s17 + $0x90] sm:$0xff] %v3435_v32  ;;  %v3373_v38 = vadd.f32 %v3309_v30, %v3238_v49  ;;  %v4637_v24 = vpop.f32.mrb[118].mxu0  ;;  %v3240_v2 = vmul.f32 %v2368_v13, %v6518_v16 }
 0x31e   : > { %v3438_v46 = vmax.f32 %v3374_v21, 0.0  ;;  %v3312_v23 = vsub.f32 %v6199_v17, %v4637_v24  ;;  %v3009_v10 = vpop.f32.mrb[119].mxu0 }
 0x31f   : > { %v3437_v42 = vmax.f32 %v3373_v38, 0.0  ;;  %v3311_v15 = vsub.f32 %v6199_v17, %v3009_v10  ;;  %v4536_v35 = vpop.f32.mrb[120].mxu1 }
 0x320   : > { %3502 = vst [vmem:[%s6210_s17 + $0xa8] sm:$0xff] %v3438_v46  ;;  %v3376_v44 = vadd.f32 %v3312_v23, %v3241_v40  ;;  %v2378_v9 = vpop.f32.mrb[121].mxu1  ;;  %v3243_v19 = vmul.f32 %v4536_v35, %v6519_v1 }
 0x321   : > { %3501 = vst [vmem:[%s6210_s17 + $0xa0] sm:$0xff] %v3437_v42  ;;  %v3375_v27 = vadd.f32 %v3311_v15, %v3240_v2  ;;  %v4640_v58 = vpop.f32.mrb[120].mxu0  ;;  %v3242_v3 = vmul.f32 %v2378_v9, %v6520_v12 }
 0x322   : > { %v3440_v22 = vmax.f32 %v3376_v44, 0.0  ;;  %v3314_v5 = vsub.f32 %v6199_v17, %v4640_v58  ;;  %v3019_v54 = vpop.f32.mrb[121].mxu0 }
 0x323   : > { %v3439_v59 = vmax.f32 %v3375_v27, 0.0  ;;  %v3313_v36 = vsub.f32 %v6199_v17, %v3019_v54  ;;  %v4539_v50 = vpop.f32.mrb[122].mxu1 }
 0x324   : > { %3504 = vst [vmem:[%s6210_s17 + $0xb8] sm:$0xff] %v3440_v22  ;;  %v3378_v56 = vadd.f32 %v3314_v5, %v3243_v19  ;;  %v2388_v34 = vpop.f32.mrb[123].mxu1  ;;  %v3245_v52 = vmul.f32 %v4539_v50, %v6521_v45 }
 0x325   : > { %3503 = vst [vmem:[%s6210_s17 + $0xb0] sm:$0xff] %v3439_v59  ;;  %v3377_v51 = vadd.f32 %v3313_v36, %v3242_v3  ;;  %v4643_v11 = vpop.f32.mrb[122].mxu0  ;;  %v3244_v39 = vmul.f32 %v2388_v34, %v6522_v60 }
 0x326   : > { %v3442_v43 = vmax.f32 %v3378_v56, 0.0  ;;  %v3316_v25 = vsub.f32 %v6199_v17, %v4643_v11  ;;  %v3029_v48 = vpop.f32.mrb[123].mxu0 }
 0x327   : > { %v3441_v62 = vmax.f32 %v3377_v51, 0.0  ;;  %v3315_v63 = vsub.f32 %v6199_v17, %v3029_v48  ;;  %v4542_v0 = vpop.f32.mrb[124].mxu1 }
 0x328   : > { %3506 = vst [vmem:[%s6210_s17 + $0xc8] sm:$0xff] %v3442_v43  ;;  %v3380_v55 = vadd.f32 %v3316_v25, %v3245_v52  ;;  %v2398_v32 = vpop.f32.mrb[125].mxu1  ;;  %v3247_v20 = vmul.f32 %v4542_v0, %v5653_v6 }
 0x329   : > { %3505 = vst [vmem:[%s6210_s17 + $0xc0] sm:$0xff] %v3441_v62  ;;  %v3379_v26 = vadd.f32 %v3315_v63, %v3244_v39  ;;  %v4646_v49 = vpop.f32.mrb[124].mxu0  ;;  %v3246_v24 = vmul.f32 %v2398_v32, %v5638_v31 }
 0x32a   : > { %v3444_v30 = vmax.f32 %v3380_v55, 0.0  ;;  %v3318_v21 = vsub.f32 %v6199_v17, %v4646_v49  ;;  %v3039_v13 = vpop.f32.mrb[125].mxu0 }
 0x32b   : > { %v3443_v38 = vmax.f32 %v3379_v26, 0.0  ;;  %v3317_v46 = vsub.f32 %v6199_v17, %v3039_v13  ;;  %v4545_v8 = vpop.f32.mrb[126].mxu1 }
 0x32c   : > { %3508 = vst [vmem:[%s6210_s17 + $0xd8] sm:$0xff] %v3444_v30  ;;  %v3382_v40 = vadd.f32 %v3318_v21, %v3247_v20  ;;  %v2408_v23 = vpop.f32.mrb[127].mxu1  ;;  %v3249_v6 = vmul.f32 %v4545_v8, %v5666_v4 }
 0x32d   : > { %3507 = vst [vmem:[%s6210_s17 + $0xd0] sm:$0xff] %v3443_v38  ;;  %v3381_v10 = vadd.f32 %v3317_v46, %v3246_v24  ;;  %v4649_v42 = vpop.f32.mrb[126].mxu0  ;;  %v3248_v31 = vmul.f32 %v2408_v23, %v5647_v47 }
 0x32e   : > { %v3446_v16 = vmax.f32 %v3382_v40, 0.0  ;;  %v3320_v2 = vsub.f32 %v6199_v17, %v4649_v42  ;;  %v3049_v15 = vpop.f32.mrb[127].mxu0 }
 0x32f   : > { %v3445_v35 = vmax.f32 %v3381_v10, 0.0  ;;  %v3319_v44 = vsub.f32 %v6199_v17, %v3049_v15  ;;  %v4548_v9 = vpop.f32.mrb[128].mxu1 }
 0x330   : > { %3510 = vst [vmem:[%s6210_s17 + $0xe8] sm:$0xff] %v3446_v16  ;;  %v3384_v27 = vadd.f32 %v3320_v2, %v3249_v6  ;;  %v2418_v58 = vpop.f32.mrb[129].mxu1  ;;  %v3251_v4 = vmul.f32 %v4548_v9, %v5401_v18 }
 0x331   : > { %3509 = vst [vmem:[%s6210_s17 + $0xe0] sm:$0xff] %v3445_v35  ;;  %v3383_v22 = vadd.f32 %v3319_v44, %v3248_v31  ;;  %v4652_v1 = vpop.f32.mrb[128].mxu0  ;;  %v3250_v47 = vmul.f32 %v2418_v58, %v5663_v29 }
 0x332   : > { %v3448_v19 = vmax.f32 %v3384_v27, 0.0  ;;  %v3322_v5 = vsub.f32 %v6199_v17, %v4652_v1  ;;  %v3059_v54 = vpop.f32.mrb[129].mxu0 }
 0x333   : > { %v3447_v59 = vmax.f32 %v3383_v22, 0.0  ;;  %v3321_v12 = vsub.f32 %v6199_v17, %v3059_v54  ;;  %v4551_v3 = vpop.f32.mrb[130].mxu1 }
 0x334   : > { %3512 = vst [vmem:[%s6210_s17 + $0xf8] sm:$0xff] %v3448_v19  ;;  %v3386_v36 = vadd.f32 %v3322_v5, %v3251_v4  ;;  %v2428_v50 = vpop.f32.mrb[131].mxu1  ;;  %v3253_v18 = vmul.f32 %v4551_v3, %v5392_v14 }
 0x335   : > { %3511 = vst [vmem:[%s6210_s17 + $0xf0] sm:$0xff] %v3447_v59  ;;  %v3385_v56 = vadd.f32 %v3321_v12, %v3250_v47  ;;  %v4655_v34 = vpop.f32.mrb[130].mxu0  ;;  %v3252_v29 = vmul.f32 %v2428_v50, %v5381_v7  ;;  %v6523_v59 = vld [vmem:[#allocation8_spill] sm:$0xff] }
 0x336   : > { %v3450_v51 = vmax.f32 %v3386_v36, 0.0  ;;  %v3324_v11 = vsub.f32 %v6199_v17, %v4655_v34  ;;  %v3069_v43 = vpop.f32.mrb[131].mxu0 }
 0x337   : > { %v3449_v45 = vmax.f32 %v3385_v56, 0.0  ;;  %v3323_v52 = vsub.f32 %v6199_v17, %v3069_v43  ;;  %v4554_v25 = vpop.f32.mrb[132].mxu1 }
 0x338   : > { %3514 = vst [vmem:[%s6210_s17 + $0x108] sm:$0xff] %v3450_v51  ;;  %v3388_v48 = vadd.f32 %v3324_v11, %v3253_v18  ;;  %v2438_v62 = vpop.f32.mrb[133].mxu1  ;;  %v3255_v14 = vmul.f32 %v4554_v25, %v5443_v41  ;;  %v6524_v51 = vld [vmem:[#allocation12_spill] sm:$0xff] }
 0x339   : > { %3513 = vst [vmem:[%s6210_s17 + $0x100] sm:$0xff] %v3449_v45  ;;  %v3387_v60 = vadd.f32 %v3323_v52, %v3252_v29  ;;  %v4658_v39 = vpop.f32.mrb[132].mxu0  ;;  %v3254_v7 = vmul.f32 %v2438_v62, %v5428_v33  ;;  %v6525_v45 = vld [vmem:[#allocation10_spill] sm:$0xff] }
 0x33a   : > { %v3452_v63 = vmax.f32 %v3388_v48, 0.0  ;;  %v3326_v0 = vsub.f32 %v6199_v17, %v4658_v39  ;;  %v3079_v55 = vpop.f32.mrb[133].mxu0 }
 0x33b   : > { %v3451_v32 = vmax.f32 %v3387_v60, 0.0  ;;  %v3325_v26 = vsub.f32 %v6199_v17, %v3079_v55  ;;  %v4557_v49 = vpop.f32.mrb[134].mxu1 }
 0x33c   : > { %3516 = vst [vmem:[%s6210_s17 + $0x118] sm:$0xff] %v3452_v63  ;;  %v3390_v30 = vadd.f32 %v3326_v0, %v3255_v14  ;;  %v2448_v20 = vpop.f32.mrb[135].mxu1  ;;  %v3257_v41 = vmul.f32 %v4557_v49, %v5434_v37  ;;  %v6526_v14 = vld [vmem:[#allocation11_spill] sm:$0xff] }
 0x33d   : > { %3515 = vst [vmem:[%s6210_s17 + $0x110] sm:$0xff] %v3451_v32  ;;  %v3389_v21 = vadd.f32 %v3325_v26, %v3254_v7  ;;  %v4661_v13 = vpop.f32.mrb[134].mxu0  ;;  %v3256_v33 = vmul.f32 %v2448_v20, %v5419_v28  ;;  %v6527_v26 = vld [vmem:[#allocation9_spill] sm:$0xff] }
 0x33e   : > { %v3454_v38 = vmax.f32 %v3390_v30, 0.0  ;;  %v3328_v24 = vsub.f32 %v6199_v17, %v4661_v13  ;;  %v3089_v46 = vpop.f32.mrb[135].mxu0 }
 0x33f   : > { %v3453_v8 = vmax.f32 %v3389_v21, 0.0  ;;  %v3327_v40 = vsub.f32 %v6199_v17, %v3089_v46  ;;  %v4560_v23 = vpop.f32.mrb[136].mxu1  ;;  %v6528_v46 = vld [vmem:[#allocation16_spill] sm:$0xff] }
 0x340   : > { %3518 = vst [vmem:[%s6210_s17 + $0x128] sm:$0xff] %v3454_v38  ;;  %v3392_v10 = vadd.f32 %v3328_v24, %v3257_v41  ;;  %v2458_v42 = vpop.f32.mrb[137].mxu1  ;;  %v3259_v37 = vmul.f32 %v4560_v23, %v5479_v61 }
 0x341   : > { %3517 = vst [vmem:[%s6210_s17 + $0x120] sm:$0xff] %v3453_v8  ;;  %v3391_v16 = vadd.f32 %v3327_v40, %v3256_v33  ;;  %v4664_v6 = vpop.f32.mrb[136].mxu0  ;;  %v3258_v28 = vmul.f32 %v2458_v42, %v5464_v53 }
 0x342   : > { %v3456_v2 = vmax.f32 %v3392_v10, 0.0  ;;  %v3330_v15 = vsub.f32 %v6199_v17, %v4664_v6  ;;  %v3099_v35 = vpop.f32.mrb[137].mxu0  ;;  %v6529_v10 = vld [vmem:[#allocation14_spill] sm:$0xff] }
 0x343   : > { %v3455_v31 = vmax.f32 %v3391_v16, 0.0  ;;  %v3329_v44 = vsub.f32 %v6199_v17, %v3099_v35  ;;  %v4563_v9 = vpop.f32.mrb[138].mxu1 }
 0x344   : > { %3520 = vst [vmem:[%s6210_s17 + $0x138] sm:$0xff] %v3456_v2  ;;  %v3394_v27 = vadd.f32 %v3330_v15, %v3259_v37  ;;  %v2468_v58 = vpop.f32.mrb[139].mxu1  ;;  %v3261_v61 = vmul.f32 %v4563_v9, %v5470_v57 }
 0x345   : > { %3519 = vst [vmem:[%s6210_s17 + $0x130] sm:$0xff] %v3455_v31  ;;  %v3393_v22 = vadd.f32 %v3329_v44, %v3258_v28  ;;  %v4667_v1 = vpop.f32.mrb[138].mxu0  ;;  %v3260_v53 = vmul.f32 %v2468_v58, %v6523_v59  ;;  %v6530_v28 = vld [vmem:[#allocation15_spill] sm:$0xff] }
 0x346   : > { %v3458_v19 = vmax.f32 %v3394_v27, 0.0  ;;  %v3332_v4 = vsub.f32 %v6199_v17, %v4667_v1  ;;  %v3109_v5 = vpop.f32.mrb[139].mxu0 }
 0x347   : > { %v3457_v54 = vmax.f32 %v3393_v22, 0.0  ;;  %v3331_v47 = vsub.f32 %v6199_v17, %v3109_v5  ;;  %v4566_v12 = vpop.f32.mrb[140].mxu1  ;;  %v6531_v22 = vld [vmem:[#allocation13_spill] sm:$0xff] }
 0x348   : > { %3522 = vst [vmem:[%s6210_s17 + $0x148] sm:$0xff] %v3458_v19  ;;  %v3396_v3 = vadd.f32 %v3332_v4, %v3261_v61  ;;  %v2478_v36 = vpop.f32.mrb[141].mxu1  ;;  %v3263_v57 = vmul.f32 %v4566_v12, %v6524_v51 }
 0x349   : > { %3521 = vst [vmem:[%s6210_s17 + $0x140] sm:$0xff] %v3457_v54  ;;  %v3395_v50 = vadd.f32 %v3331_v47, %v3260_v53  ;;  %v4670_v56 = vpop.f32.mrb[140].mxu0  ;;  %v3262_v29 = vmul.f32 %v2478_v36, %v6525_v45  ;;  %v6532_v47 = vld [vmem:[#allocation22_spill] sm:$0xff] }
 0x34a   : > { %v3460_v34 = vmax.f32 %v3396_v3, 0.0  ;;  %v3334_v18 = vsub.f32 %v6199_v17, %v4670_v56  ;;  %v3119_v11 = vpop.f32.mrb[141].mxu0  ;;  %v6533_v56 = vld [vmem:[#allocation19_spill] sm:$0xff] }
 0x34b   : > { %v3459_v43 = vmax.f32 %v3395_v50, 0.0  ;;  %v3333_v52 = vsub.f32 %v6199_v17, %v3119_v11  ;;  %v4569_v25 = vpop.f32.mrb[142].mxu1 }
 0x34c   : > { %3524 = vst [vmem:[%s6210_s17 + $0x158] sm:$0xff] %v3460_v34  ;;  %v3398_v48 = vadd.f32 %v3334_v18, %v3263_v57  ;;  %v2488_v62 = vpop.f32.mrb[143].mxu1  ;;  %v3265_v0 = vmul.f32 %v4569_v25, %v6526_v14 }
 0x34d   : > { %3523 = vst [vmem:[%s6210_s17 + $0x150] sm:$0xff] %v3459_v43  ;;  %v3397_v60 = vadd.f32 %v3333_v52, %v3262_v29  ;;  %v4673_v39 = vpop.f32.mrb[142].mxu0  ;;  %v3264_v49 = vmul.f32 %v2488_v62, %v6527_v26  ;;  %v6534_v52 = vld [vmem:[#allocation21_spill] sm:$0xff] }
 0x34e   : > { %v3462_v63 = vmax.f32 %v3398_v48, 0.0  ;;  %v3336_v55 = vsub.f32 %v6199_v17, %v4673_v39  ;;  %v3129_v32 = vpop.f32.mrb[143].mxu0  ;;  %v6535_v39 = vld [vmem:[#allocation17_spill] sm:$0xff] }
 0x34f   : > { %v3461_v7 = vmax.f32 %v3397_v60, 0.0  ;;  %v3335_v30 = vsub.f32 %v6199_v17, %v3129_v32  ;;  %v4572_v20 = vpop.f32.mrb[144].mxu1 }
 0x350   : > { %3526 = vst [vmem:[%s6210_s17 + $0x168] sm:$0xff] %v3462_v63  ;;  %v3400_v21 = vadd.f32 %v3336_v55, %v3265_v0  ;;  %v2498_v13 = vpop.f32.mrb[145].mxu1  ;;  %v3267_v8 = vmul.f32 %v4572_v20, %v6528_v46 }
 0x351   : > { %3525 = vst [vmem:[%s6210_s17 + $0x160] sm:$0xff] %v3461_v7  ;;  %v3399_v38 = vadd.f32 %v3335_v30, %v3264_v49  ;;  %v4676_v41 = vpop.f32.mrb[144].mxu0  ;;  %v3266_v42 = vmul.f32 %v2498_v13, %v6529_v10  ;;  %v6536_v30 = vld [vmem:[#allocation30_spill] sm:$0xff] }
 0x352   : > { %v3464_v24 = vmax.f32 %v3400_v21, 0.0  ;;  %v3338_v33 = vsub.f32 %v6199_v17, %v4676_v41  ;;  %v3139_v40 = vpop.f32.mrb[145].mxu0  ;;  %v6537_v41 = vld [vmem:[#allocation26_spill] sm:$0xff] }
 0x353   : > { %v3463_v23 = vmax.f32 %v3399_v38, 0.0  ;;  %v3337_v16 = vsub.f32 %v6199_v17, %v3139_v40  ;;  %v4575_v6 = vpop.f32.mrb[146].mxu1 }
 0x354   : > { %3528 = vst [vmem:[%s6210_s17 + $0x178] sm:$0xff] %v3464_v24  ;;  %v3402_v2 = vadd.f32 %v3338_v33, %v3267_v8  ;;  %v2508_v37 = vpop.f32.mrb[147].mxu1  ;;  %v3269_v44 = vmul.f32 %v4575_v6, %v6530_v28 }
 0x355   : > { %3527 = vst [vmem:[%s6210_s17 + $0x170] sm:$0xff] %v3463_v23  ;;  %v3401_v15 = vadd.f32 %v3337_v16, %v3266_v42  ;;  %v4679_v35 = vpop.f32.mrb[146].mxu0  ;;  %v3268_v1 = vmul.f32 %v2508_v37, %v6531_v22  ;;  %v6538_v16 = vld [vmem:[#allocation28_spill] sm:$0xff] }
 0x356   : > { %v3466_v31 = vmax.f32 %v3402_v2, 0.0  ;;  %v3340_v9 = vsub.f32 %v6199_v17, %v4679_v35  ;;  %v3149_v27 = vpop.f32.mrb[147].mxu0  ;;  %v6539_v35 = vld [vmem:[#allocation24_spill] sm:$0xff] }
 0x357   : > { %v3465_v58 = vmax.f32 %v3401_v15, 0.0  ;;  %v3339_v19 = vsub.f32 %v6199_v17, %v3149_v27  ;;  %v4578_v61 = vpop.f32.mrb[148].mxu1 }
 0x358   : > { %3530 = vst [vmem:[%s6210_s17 + $0x188] sm:$0xff] %v3466_v31  ;;  %v3404_v4 = vadd.f32 %v3340_v9, %v3269_v44  ;;  %v2518_v5 = vpop.f32.mrb[149].mxu1  ;;  %v3271_v12 = vmul.f32 %v4578_v61, %v6532_v47 }
 0x359   : > { %3529 = vst [vmem:[%s6210_s17 + $0x180] sm:$0xff] %v3465_v58  ;;  %v3403_v54 = vadd.f32 %v3339_v19, %v3268_v1  ;;  %v4682_v59 = vpop.f32.mrb[148].mxu0  ;;  %v3270_v34 = vmul.f32 %v2518_v5, %v6533_v56  ;;  %v6540_v19 = vld [vmem:[#allocation35_spill] sm:$0xff] }
 0x35a   : > { %v3468_v53 = vmax.f32 %v3404_v4, 0.0  ;;  %v3342_v3 = vsub.f32 %v6199_v17, %v4682_v59  ;;  %v3159_v36 = vpop.f32.mrb[149].mxu0  ;;  %v6541_v59 = vld [vmem:[#allocation33_spill] sm:$0xff] }
 0x35b   : > { %v3467_v50 = vmax.f32 %v3403_v54, 0.0  ;;  %v3341_v51 = vsub.f32 %v6199_v17, %v3159_v36  ;;  %v4581_v57 = vpop.f32.mrb[150].mxu1 }
 0x35c   : > { %3532 = vst [vmem:[%s6210_s17 + $0x198] sm:$0xff] %v3468_v53  ;;  %v3406_v18 = vadd.f32 %v3342_v3, %v3271_v12  ;;  %v2528_v11 = vpop.f32.mrb[151].mxu1  ;;  %v3273_v25 = vmul.f32 %v4581_v57, %v6534_v52 }
 0x35d   : > { %3531 = vst [vmem:[%s6210_s17 + $0x190] sm:$0xff] %v3467_v50  ;;  %v3405_v43 = vadd.f32 %v3341_v51, %v3270_v34  ;;  %v4685_v45 = vpop.f32.mrb[150].mxu0  ;;  %v3272_v63 = vmul.f32 %v2528_v11, %v6535_v39  ;;  %v6542_v51 = vld [vmem:[#allocation34_spill] sm:$0xff] }
 0x35e   : > { %v3470_v29 = vmax.f32 %v3406_v18, 0.0  ;;  %v3344_v48 = vsub.f32 %v6199_v17, %v4685_v45  ;;  %v3169_v62 = vpop.f32.mrb[151].mxu0  ;;  %v6543_v45 = vld [vmem:[#allocation32_spill] sm:$0xff] }
 0x35f   : > { %v3469_v60 = vmax.f32 %v3405_v43, 0.0  ;;  %v3343_v14 = vsub.f32 %v6199_v17, %v3169_v62  ;;  %v4584_v0 = vpop.f32.mrb[152].mxu1 }
 0x360   : > { %3534 = vst [vmem:[%s6210_s17 + $0x1a8] sm:$0xff] %v3470_v29  ;;  %v3408_v55 = vadd.f32 %v3344_v48, %v3273_v25  ;;  %v2538_v32 = vpop.f32.mrb[153].mxu1  ;;  %v3275_v20 = vmul.f32 %v4584_v0, %v6536_v30 }
 0x361   : > { %3533 = vst [vmem:[%s6210_s17 + $0x1a0] sm:$0xff] %v3469_v60  ;;  %v3407_v7 = vadd.f32 %v3343_v14, %v3272_v63  ;;  %v4688_v26 = vpop.f32.mrb[152].mxu0  ;;  %v3274_v24 = vmul.f32 %v2538_v32, %v6537_v41 }
 0x362   : > { %v3472_v49 = vmax.f32 %v3408_v55, 0.0  ;;  %v3346_v21 = vsub.f32 %v6199_v17, %v4688_v26  ;;  %v3179_v13 = vpop.f32.mrb[153].mxu0 }
 0x363   : > { %v3471_v38 = vmax.f32 %v3407_v7, 0.0  ;;  %v3345_v46 = vsub.f32 %v6199_v17, %v3179_v13  ;;  %v4587_v8 = vpop.f32.mrb[154].mxu1 }
 0x364   : > { %3536 = vst [vmem:[%s6210_s17 + $0x1b8] sm:$0xff] %v3472_v49  ;;  %v3410_v33 = vadd.f32 %v3346_v21, %v3275_v20  ;;  %v2548_v40 = vpop.f32.mrb[155].mxu1  ;;  %v3277_v6 = vmul.f32 %v4587_v8, %v6538_v16 }
 0x365   : > { %3535 = vst [vmem:[%s6210_s17 + $0x1b0] sm:$0xff] %v3471_v38  ;;  %v3409_v23 = vadd.f32 %v3345_v46, %v3274_v24  ;;  %v4691_v10 = vpop.f32.mrb[154].mxu0  ;;  %v3276_v31 = vmul.f32 %v2548_v40, %v6539_v35 }
 0x366   : > { %v3474_v42 = vmax.f32 %v3410_v33, 0.0  ;;  %v3348_v2 = vsub.f32 %v6199_v17, %v4691_v10  ;;  %v3189_v37 = vpop.f32.mrb[155].mxu0 }
 0x367   : > { %v3473_v15 = vmax.f32 %v3409_v23, 0.0  ;;  %v3347_v28 = vsub.f32 %v6199_v17, %v3189_v37  ;;  %v4590_v44 = vpop.f32.mrb[156].mxu1 }
 0x368   : > { %3538 = vst [vmem:[%s6210_s17 + $0x1c8] sm:$0xff] %v3474_v42  ;;  %v3412_v9 = vadd.f32 %v3348_v2, %v3277_v6  ;;  %v2558_v27 = vpop.f32.mrb[157].mxu1  ;;  %v3279_v61 = vmul.f32 %v4590_v44, %v6540_v19 }
 0x369   : > { %3537 = vst [vmem:[%s6210_s17 + $0x1c0] sm:$0xff] %v3473_v15  ;;  %v3411_v58 = vadd.f32 %v3347_v28, %v3276_v31  ;;  %v4694_v22 = vpop.f32.mrb[156].mxu0  ;;  %v3278_v53 = vmul.f32 %v2558_v27, %v6541_v59 }
 0x36a   : > { %v3476_v1 = vmax.f32 %v3412_v9, 0.0  ;;  %v3350_v4 = vsub.f32 %v6199_v17, %v4694_v22  ;;  %v3199_v5 = vpop.f32.mrb[157].mxu0 }
 0x36b   : > { %v3475_v54 = vmax.f32 %v3411_v58, 0.0  ;;  %v3349_v47 = vsub.f32 %v6199_v17, %v3199_v5  ;;  %v4593_v12 = vpop.f32.mrb[158].mxu1 }
 0x36c   : > { %3540 = vst [vmem:[%s6210_s17 + $0x1d8] sm:$0xff] %v3476_v1  ;;  %v3414_v3 = vadd.f32 %v3350_v4, %v3279_v61  ;;  %v2568_v36 = vpop.f32.mrb[159].mxu1  ;;  %v3281_v57 = vmul.f32 %v4593_v12, %v6542_v51 }
 0x36d   : > { %3539 = vst [vmem:[%s6210_s17 + $0x1d0] sm:$0xff] %v3475_v54  ;;  %v3413_v50 = vadd.f32 %v3349_v47, %v3278_v53  ;;  %v4697_v56 = vpop.f32.mrb[158].mxu0  ;;  %v3280_v29 = vmul.f32 %v2568_v36, %v6543_v45 }
 0x36e   : > { %v3478_v34 = vmax.f32 %v3414_v3, 0.0  ;;  %v3352_v18 = vsub.f32 %v6199_v17, %v4697_v56  ;;  %v3209_v11 = vpop.f32.mrb[159].mxu0 }
 0x36f   : > { %v3477_v43 = vmax.f32 %v3413_v50, 0.0  ;;  %v3351_v52 = vsub.f32 %v6199_v17, %v3209_v11 }
 0x370   : > { %3542 = vst [vmem:[%s6210_s17 + $0x1e8] sm:$0xff] %v3478_v34  ;;  %v3416_v25 = vadd.f32 %v3352_v18, %v3281_v57 }
 0x371   : > { %3541 = vst [vmem:[%s6210_s17 + $0x1e0] sm:$0xff] %v3477_v43  ;;  %v3415_v48 = vadd.f32 %v3351_v52, %v3280_v29 }
 0x372   : > { %v3480_v62 = vmax.f32 %v3416_v25, 0.0 }
 0x373   : > { %v3479_v60 = vmax.f32 %v3415_v48, 0.0 }
 0x374   : > { %3544 = vst [vmem:[%s6210_s17 + $0x1f8] sm:$0xff] %v3480_v62 }
 0x375   : > { %3543 = vst [vmem:[%s6210_s17 + $0x1f0] sm:$0xff] %v3479_v60 }
 0x376   : > { %5055 = shalt.err (!%p5052_p2)
}
 0x377   : > { %s5056_s11 = scalar_lea.hbm %s6399_s16, 8192  ;;  %s5060_s15 = scalar_lea.hbm %s6453_s6, 16384 }
 0x378   : > { %p5057_p4 = scmp.ne.s32.totalorder %s6399_s16, %s5056_s11  ;;  %p5061_p9 = scmp.lt.u32.totalorder %s6399_s16, %s6453_s6 }
 0x379   : > { %p5062_p1 = scmp.lt.u32.totalorder %s5060_s15, %s5056_s11  ;;  %p5064_p6 = scmp.lt.u32.totalorder %s5056_s11, %s6399_s16 }
 0x37a   : > { %p5058_p5 = pnand %p5057_p4, %p6544_p11 }
 0x37b   : > { %p5063_p3 = por %p5062_p1, %p5061_p9 }
 0x37c   : > { %p5059_p7 = pneg %p5058_p5 }
 0x37d   : > { %p5065_p12 = por %p5064_p6, %p5063_p3 }
 0x37f   : > { %p5066_p13 = pnand %p5065_p12, %p5059_p7 }
 0x381   : > { %5069 = shalt.err (!%p5066_p13)
}
 0x382   : > { %s5114_s7 = smov 128   ;;  %s5115_s12 = smov 8  }
 0x383   : > { %4796 = dma.vmem_to_hbm [thread:$0]  (%p6544_p11), %s6401_s28, 8192, %s6399_s16, %s3546_s25, %s5114_s7, %s5114_s7, %s5115_s12  }
 0x384 PF: > { %s3574_s18 = sand.u32 1, %s5096_s21   ;;  %p6545_p8 = scmp.ne.s32.totalorder %s6486_s10, 0 }
 0x385   : > { %p6546_p10 = scmp.ge.s32.totalorder %s5108_s24, 2  ;;  %s3575_s13 = scalar_lea.sflag [#allocation4], %s3574_s18 }
 0x387   : > { %p4803_p0 = pnand %p6546_p10, %p6545_p8 }
 0x389   : > { %5091 = dma.done.wait (!%p4803_p0), %s3575_s13, 8192  }
 0x38a   : > { %5093 = vsyncadd (!%p4803_p0), %s3575_s13, 4294959104  ;;  %p19_p2 = scmp.ge.s32.totalorder %s5176_s27, 4   ;;  %s6547_s21 = smov %s5100_s22 }
 0x38b   : > { %s6548_s22 = smov %s5104_s23  ;;  %s6549_s23 = smov %s5188_s30 }
 0x38c   : > { %s6550_s24 = smov %s5176_s27  ;;  %21 = sbr.rel (!%p19_p2) target bundleno = 5 (0x5), region = 89 }
 0x393   :  { %3580 = vsyncpa [#allocation3], 1 }
 0x394   :  { %3582 = vsyncpa [#allocation3 + $0x1], 1 }
 0x395   :  { %3583 = vsyncpa [#allocation4], 1 }
 0x396   :  { %3585 = vsyncpa [#allocation4 + $0x1], 1 }

</bundles_post_ra>
